<compile_context>
chip_gen: v5e
topology: v5e:2x2
jax: 0.10.0
libtpu: 0.0.40
codegen_flags: <defaults>
</compile_context>

<pallas_src>
import functools
import math

import numpy as np
import jax
import jax.numpy as jnp
from jax.experimental import pallas as pl
from jax.experimental.pallas import tpu as pltpu

# ------------------------- small, module-consistent configuration ------------
SR = 1000              # sampling rate (reference: 16000)
FRAME_SIZE = 64        # reference: 320
HOP = 32               # reference: 160
N_MELS = 16            # reference: 120
# Exactly-representable duration so int((start + dur) * SR) and the
# "< input_duration * second_samples" early-break check behave like integers.
INPUT_DUR = 2.5
N_FFT = FRAME_SIZE + 1                 # n_fft = frame_size + 1  (= 65)
N_FREQ = N_FFT // 2 + 1                # onesided bins           (= 33)
SEG_LEN = int(INPUT_DUR * SR)          # samples per analysed segment (2500)
N_FRAMES = 1 + (SEG_LEN - HOP) // HOP  # frames of seg[..., :-HOP], center=True
PERSONALIZED = False

ROW_TILE = 256                         # frame-row tile for the mel kernel
MEL_LANES = 128                        # lane-dense mel output width
HEAD_LANES = 128                       # lane-dense fused-head output width
K_HEAD = SEG_LEN + N_FRAMES * N_MELS   # fused-head contraction dim
K_HEAD_PAD = -(-K_HEAD // 128) * 128   # padded to a 128 multiple


# ------------------------- Pallas kernels ------------------------------------
def melspec_kernel(frames_ref, trig_ref, melfb2_ref, out_ref):
    """Fused windowed-DFT power spectrum + slaney mel projection.

    frames_ref : (ROW_TILE, N_FFT)   audio frames
    trig_ref   : (N_FFT, 128)        [win*cos | win*sin | zeros]
    melfb2_ref : (128, 128)          stacked mel filterbank (cos^2 + sin^2)
    out_ref    : (ROW_TILE, 128)     mel energies in cols [:N_MELS], rest zero
    """
    y = jnp.dot(frames_ref[...], trig_ref[...],
                preferred_element_type=jnp.float32)        # (TR, 128)
    out_ref[...] = jnp.dot(y * y, melfb2_ref[...],
                           preferred_element_type=jnp.float32)  # (TR, 128)


def fused_head_kernel(x_ref, w_ref, b_ref, o_ref):
    """Single-shot matmul+bias surrogate for both ONNX heads (lane-padded)."""
    o_ref[...] = jnp.dot(x_ref[...], w_ref[...],
                         preferred_element_type=jnp.float32) + b_ref[...]


# ------------------------- wrappers around pallas_call ------------------------
def compute_mel(x, trig, melfb2):
    """x: (R, Tm) waveform rows -> mel features (R, n_frames, N_MELS)."""
    R, Tm = x.shape
    pad = N_FFT // 2
    xp = jnp.pad(x, ((0, 0), (pad, pad)))                  # center=True, constant pad
    n_frames = 1 + Tm // HOP
    # Static frame-gather indices (host-side numpy); the resulting XLA gather is
    # modest at this scale -- see review note about in-kernel pl.ds framing.
    idx = np.arange(n_frames)[:, None] * HOP + np.arange(N_FFT)[None, :]
    frames = xp[:, idx].reshape(R * n_frames, N_FFT)       # (rows, n_fft)

    rows = R * n_frames
    rows_pad = -(-rows // ROW_TILE) * ROW_TILE
    frames_p = jnp.pad(frames, ((0, rows_pad - rows), (0, 0)))

    mel128 = pl.pallas_call(
        melspec_kernel,
        out_shape=jax.ShapeDtypeStruct((rows_pad, MEL_LANES), jnp.float32),
        grid=(rows_pad // ROW_TILE,),
        in_specs=[
            pl.BlockSpec((ROW_TILE, N_FFT), lambda i: (i, 0)),
            pl.BlockSpec((N_FFT, MEL_LANES), lambda i: (0, 0)),
            pl.BlockSpec((MEL_LANES, MEL_LANES), lambda i: (0, 0)),
        ],
        out_specs=pl.BlockSpec((ROW_TILE, MEL_LANES), lambda i: (i, 0)),
        compiler_params=pltpu.CompilerParams(dimension_semantics=("parallel",)),
    )(frames_p, trig, melfb2)

    return mel128[:rows, :N_MELS].reshape(R, n_frames, N_MELS)


def fused_heads(x, w_cat, b_cat):
    """x: (R, K_HEAD) -> (R, 4) = [p808, sig, bak, ovr] raw scores."""
    R, K = x.shape
    r_pad = -(-R // 8) * 8
    x_p = jnp.pad(x, ((0, r_pad - R), (0, K_HEAD_PAD - K)))
    out = pl.pallas_call(
        fused_head_kernel,
        out_shape=jax.ShapeDtypeStruct((r_pad, HEAD_LANES), jnp.float32),
    )(x_p, w_cat, b_cat)
    return out[:R, :4]


# ------------------------- plain-jnp epilogues (KB-scale) ---------------------
def db_norm(mel):
    """power_to_db (amin=1e-10, top_db=80) per SEGMENT, then (x + 40) / 40.

    mel: (S, B, F, M). The reference calls power_to_db once per segment on the
    whole (B, n_mels, T) tensor, so reductions are over axes (1, 2, 3).
    """
    amin = 1e-10
    top_db = 80.0
    ref_value = jnp.abs(jnp.max(mel, axis=(1, 2, 3), keepdims=True))
    log_spec = 10.0 * jnp.log10(jnp.maximum(mel, amin))
    log_spec = log_spec - 10.0 * jnp.log10(jnp.maximum(amin, ref_value))
    log_spec = jnp.maximum(
        log_spec, jnp.max(log_spec, axis=(1, 2, 3), keepdims=True) - top_db)
    return (log_spec + 40.0) / 40.0


def polyfit_and_mean(mos, poly_c):
    """Per-column polynomial calibration then mean over segments. mos: (S,B,4)."""
    c2, c1, c0 = poly_c
    y = (c2 * mos + c1) * mos + c0
    return jnp.mean(y, axis=0)                             # (B, 4)


# ------------------------- deterministic parameter setup ----------------------
def _hz_to_mel_slaney(f):
    f = np.asarray(f, dtype=np.float64)
    f_sp = 200.0 / 3
    min_log_hz = 1000.0
    min_log_mel = min_log_hz / f_sp
    logstep = np.log(6.4) / 27.0
    return np.where(f >= min_log_hz,
                    min_log_mel + np.log(np.maximum(f, min_log_hz) / min_log_hz) / logstep,
                    f / f_sp)


def _mel_to_hz_slaney(m):
    m = np.asarray(m, dtype=np.float64)
    f_sp = 200.0 / 3
    min_log_hz = 1000.0
    min_log_mel = min_log_hz / f_sp
    logstep = np.log(6.4) / 27.0
    return np.where(m >= min_log_mel,
                    min_log_hz * np.exp(logstep * (m - min_log_mel)),
                    m * f_sp)


def _mel_filterbank():
    """slaney-scale, slaney-norm mel filterbank, shape (N_MELS, N_FREQ)."""
    fftfreqs = np.linspace(0.0, SR / 2.0, N_FREQ)
    mel_pts = np.linspace(_hz_to_mel_slaney(0.0), _hz_to_mel_slaney(SR / 2.0),
                          N_MELS + 2)
    hz_pts = _mel_to_hz_slaney(mel_pts)
    fdiff = np.diff(hz_pts)
    ramps = hz_pts[:, None] - fftfreqs[None, :]
    lower = -ramps[:-2] / fdiff[:-1, None]
    upper = ramps[2:] / fdiff[1:, None]
    fb = np.maximum(0.0, np.minimum(lower, upper))
    enorm = 2.0 / (hz_pts[2:N_MELS + 2] - hz_pts[:N_MELS])
    fb *= enorm[:, None]
    return fb.astype(np.float32)


def build_constants_and_params():
    # Windowed DFT basis, fused [cos | sin] and lane-padded to 128.
    n = np.arange(N_FFT)
    k = np.arange(N_FREQ)
    window = 0.5 - 0.5 * np.cos(2.0 * np.pi * n / N_FFT)   # hann, periodic
    ang = 2.0 * np.pi * np.outer(n, k) / N_FFT
    trig = np.zeros((N_FFT, MEL_LANES), dtype=np.float32)
    trig[:, :N_FREQ] = (window[:, None] * np.cos(ang)).astype(np.float32)
    trig[:, N_FREQ:2 * N_FREQ] = (window[:, None] * np.sin(ang)).astype(np.float32)

    # Stacked mel filterbank: rows [0:N_FREQ] pick up cos^2, rows
    # [N_FREQ:2*N_FREQ] pick up sin^2 -> power spectrum + mel in one matmul.
    melfb = _mel_filterbank()                               # (N_MELS, N_FREQ)
    melfb2 = np.zeros((MEL_LANES, MEL_LANES), dtype=np.float32)
    melfb2[:N_FREQ, :N_MELS] = melfb.T
    melfb2[N_FREQ:2 * N_FREQ, :N_MELS] = melfb.T

    # Surrogate ONNX-head weights (deterministic), packed into a single fused,
    # lane-padded matrix: column 0 = p808 head (consumes mel features),
    # columns 1..3 = base head (consumes raw audio segment).
    k1, k2 = jax.random.split(jax.random.PRNGKey(42), 2)
    w_base = np.asarray(jax.random.normal(k1, (SEG_LEN, 3), dtype=jnp.float32)) * 1e-3
    w_p808 = np.asarray(jax.random.normal(k2, (N_FRAMES * N_MELS, 1),
                                          dtype=jnp.float32)) * 1e-2
    w_cat = np.zeros((K_HEAD_PAD, HEAD_LANES), dtype=np.float32)
    w_cat[SEG_LEN:SEG_LEN + N_FRAMES * N_MELS, 0] = w_p808[:, 0]
    w_cat[:SEG_LEN, 1:4] = w_base
    b_cat = np.zeros((1, HEAD_LANES), dtype=np.float32)
    b_cat[0, :4] = [3.5, 3.0, 3.2, 2.8]                     # [p808, sig, bak, ovr]

    # Polyfit coefficients (personalized=False); column 0 (p808) is identity.
    c2 = np.array([0.0, -0.08397278, -0.13166888, -0.06766283], dtype=np.float32)
    c1 = np.array([1.0, 1.22083953, 1.60915514, 1.11546468], dtype=np.float32)
    c0 = np.array([0.0, 0.0052439, -0.39604546, 0.04602535], dtype=np.float32)

    return dict(
        trig=jnp.asarray(trig),
        melfb2=jnp.asarray(melfb2),
        w_cat=jnp.asarray(w_cat),
        b_cat=jnp.asarray(b_cat),
        poly_c=(jnp.asarray(c2), jnp.asarray(c1), jnp.asarray(c0)),
    )


# ------------------------- forward --------------------------------------------
@functools.partial(jax.jit, static_argnums=(3,))
def _forward_jit(audio, sample_idx, params, num_segments):
    B = audio.shape[0]

    # Circular padding of each waveform to the common padded length.
    audio_padded = jnp.take_along_axis(audio, sample_idx, axis=1)   # (B, pad_len)

    # Batch all segments: (S, B, SEG_LEN).
    segs = []
    for i in range(num_segments):
        s = int(i * SR)
        e = int((i + INPUT_DUR) * SR)
        segs.append(audio_padded[:, s:e])
    segs = jnp.stack(segs, axis=0)
    S = num_segments
    segs_flat = segs.reshape(S * B, SEG_LEN)

    # Mel front-end (single row-tiled Pallas pass over all S*B*n_frames frames).
    mel = compute_mel(segs_flat[:, :-HOP], params["trig"], params["melfb2"])
    feats = db_norm(mel.reshape(S, B, N_FRAMES, N_MELS))            # (S,B,F,M)

    # Fused surrogate heads: [audio_seg | mel_feats] @ packed weights -> (S*B, 4).
    x_cat = jnp.concatenate(
        [segs_flat, feats.reshape(S * B, N_FRAMES * N_MELS)], axis=-1)
    mos4 = fused_heads(x_cat, params["w_cat"], params["b_cat"])     # (S*B, 4)

    mos = polyfit_and_mean(mos4.reshape(S, B, 4), params["poly_c"])  # (B, 4)
    return mos[:, 0], mos[:, 1], mos[:, 2], mos[:, 3]


def dnsmos_forward(audio, lens_np, params):
    """audio: (B, T) f32, lens_np: (B,) int -> tuple of 4 arrays of shape (B,)."""
    B, _ = audio.shape

    # Host-side (static) segment bookkeeping, mirroring the reference module.
    durations = lens_np.astype(np.float64) / SR
    pad_len = int(np.max(np.ceil(INPUT_DUR / durations) * lens_np))
    sample_idx = (np.arange(pad_len)[None, :] % lens_np[:, None]).astype(np.int32)

    num_seconds = int(np.floor(pad_len / SR) - INPUT_DUR) + 1
    second_samples = int(1.0 * SR)
    num_segments = 0
    for start_second in range(num_seconds):
        s = int(start_second * second_samples)
        e = int((start_second + INPUT_DUR) * second_samples)
        if min(e, pad_len) - s < INPUT_DUR * second_samples:
            break
        num_segments += 1
    assert num_segments >= 1, "input too short for a single analysis segment"

    return _forward_jit(audio, jnp.asarray(sample_idx), params, num_segments)


# ------------------------- main ------------------------------------------------
if __name__ == "__main__":
    key = jax.random.PRNGKey(0)
    B, T = 2, 4100
    audio = jax.random.normal(key, (B, T), dtype=jnp.float32) * 0.1
    lens = np.array([4100, 900], dtype=np.int64)

    params = build_constants_and_params()
    p808_mos, mos_sig, mos_bak, mos_ovr = dnsmos_forward(audio, lens, params)

    for out in (p808_mos, mos_sig, mos_bak, mos_ovr):
        jax.block_until_ready(out)
        assert out.shape == (B,) and out.dtype == jnp.float32
        assert bool(jnp.all(jnp.isfinite(out)))

    print("KERNEL_OK")
</pallas_src>

<mosaic_0001>
module attributes {stable_mosaic.version = 11 : i64} {
  func.func @melspec_kernel(%arg0: i32, %arg1: memref<256x65xf32, #tpu.memory_space<vmem>>, %arg2: memref<65x128xf32, #tpu.memory_space<vmem>>, %arg3: memref<128x128xf32, #tpu.memory_space<vmem>>, %arg4: memref<256x128xf32, #tpu.memory_space<vmem>>) attributes {dimension_semantics = [#tpu.dimension_semantics<parallel>], iteration_bounds = array<i64: 2>, scalar_prefetch = 0 : i64, scratch_operands = 0 : i64, tpu.core_type = #tpu.core_type<tc>, window_params = [{transform_indices = @transform_0, window_bounds = array<i64: 256, 65>}, {pipeline_mode = #tpu.pipeline_mode<synchronous>, transform_indices = @transform_1, window_bounds = array<i64: 65, 128>}, {pipeline_mode = #tpu.pipeline_mode<synchronous>, transform_indices = @transform_2, window_bounds = array<i64: 128, 128>}, {transform_indices = @transform_3, window_bounds = array<i64: 256, 128>}]} {
    %c0 = arith.constant 0 : index
    %c0_0 = arith.constant 0 : index
    %0 = vector.load %arg1[%c0, %c0_0] : memref<256x65xf32, #tpu.memory_space<vmem>>, vector<256x65xf32>
    %c0_1 = arith.constant 0 : index
    %c0_2 = arith.constant 0 : index
    %1 = vector.load %arg2[%c0_1, %c0_2] : memref<65x128xf32, #tpu.memory_space<vmem>>, vector<65x128xf32>
    %cst = arith.constant dense<0.000000e+00> : vector<256x128xf32>
    %2 = tpu.matmul %0, %1, %cst {dimension_numbers = #tpu.dot_dimension_numbers<[1], [0], [0], [1], [0, 0, 1, 1], [], []>} : vector<256x65xf32>, vector<65x128xf32>, vector<256x128xf32> -> vector<256x128xf32>
    %3 = arith.mulf %2, %2 : vector<256x128xf32>
    %c0_3 = arith.constant 0 : index
    %c0_4 = arith.constant 0 : index
    %4 = vector.load %arg3[%c0_3, %c0_4] : memref<128x128xf32, #tpu.memory_space<vmem>>, vector<128x128xf32>
    %cst_5 = arith.constant dense<0.000000e+00> : vector<256x128xf32>
    %5 = tpu.matmul %3, %4, %cst_5 {dimension_numbers = #tpu.dot_dimension_numbers<[1], [0], [0], [1], [0, 0, 1, 1], [], []>} : vector<256x128xf32>, vector<128x128xf32>, vector<256x128xf32> -> vector<256x128xf32>
    %c0_6 = arith.constant 0 : index
    %c0_7 = arith.constant 0 : index
    %6 = vector.load %arg4[%c0_6, %c0_7] : memref<256x128xf32, #tpu.memory_space<vmem>>, vector<256x128xf32>
    tpu.vector_store %arg4[%c0_6, %c0_7], %5 {strides = array<i32>} : memref<256x128xf32, #tpu.memory_space<vmem>>, vector<256x128xf32>,
    return
  }
  func.func @transform_0(%arg0: i32) -> (i32, i32) {
    %c0_i32 = arith.constant 0 : i32
    %c0_i32_0 = arith.constant 0 : i32
    return %arg0, %c0_i32 : i32, i32
  }
  func.func @transform_1(%arg0: i32) -> (i32, i32) {
    %c0_i32 = arith.constant 0 : i32
    %c0_i32_0 = arith.constant 0 : i32
    %c0_i32_1 = arith.constant 0 : i32
    return %c0_i32, %c0_i32_0 : i32, i32
  }
  func.func @transform_2(%arg0: i32) -> (i32, i32) {
    %c0_i32 = arith.constant 0 : i32
    %c0_i32_0 = arith.constant 0 : i32
    %c0_i32_1 = arith.constant 0 : i32
    return %c0_i32, %c0_i32_0 : i32, i32
  }
  func.func @transform_3(%arg0: i32) -> (i32, i32) {
    %c0_i32 = arith.constant 0 : i32
    %c0_i32_0 = arith.constant 0 : i32
    return %arg0, %c0_i32 : i32, i32
  }
}

module attributes {stable_mosaic.version = 11 : i64} {
  func.func @fused_head_kernel(%arg0: memref<8x3840xf32, #tpu.memory_space<vmem>>, %arg1: memref<3840x128xf32, #tpu.memory_space<vmem>>, %arg2: memref<1x128xf32, #tpu.memory_space<vmem>>, %arg3: memref<8x128xf32, #tpu.memory_space<vmem>>) attributes {dimension_semantics = [], scalar_prefetch = 0 : i64, scratch_operands = 0 : i64, tpu.core_type = #tpu.core_type<tc>} {
    %c0 = arith.constant 0 : index
    %c0_0 = arith.constant 0 : index
    %0 = vector.load %arg0[%c0, %c0_0] : memref<8x3840xf32, #tpu.memory_space<vmem>>, vector<8x3840xf32>
    %c0_1 = arith.constant 0 : index
    %c0_2 = arith.constant 0 : index
    %1 = vector.load %arg1[%c0_1, %c0_2] : memref<3840x128xf32, #tpu.memory_space<vmem>>, vector<3840x128xf32>
    %cst = arith.constant dense<0.000000e+00> : vector<8x128xf32>
    %2 = tpu.matmul %0, %1, %cst {dimension_numbers = #tpu.dot_dimension_numbers<[1], [0], [0], [1], [0, 0, 1, 1], [], []>} : vector<8x3840xf32>, vector<3840x128xf32>, vector<8x128xf32> -> vector<8x128xf32>
    %c0_3 = arith.constant 0 : index
    %c0_4 = arith.constant 0 : index
    %3 = vector.load %arg2[%c0_3, %c0_4] : memref<1x128xf32, #tpu.memory_space<vmem>>, vector<1x128xf32>
    %4 = vector.broadcast %3 : vector<1x128xf32> to vector<8x128xf32>
    %5 = arith.addf %2, %4 : vector<8x128xf32>
    %c0_5 = arith.constant 0 : index
    %c0_6 = arith.constant 0 : index
    %6 = vector.load %arg3[%c0_5, %c0_6] : memref<8x128xf32, #tpu.memory_space<vmem>>, vector<8x128xf32>
    tpu.vector_store %arg3[%c0_5, %c0_6], %5 {strides = array<i32>} : memref<8x128xf32, #tpu.memory_space<vmem>>, vector<8x128xf32>,
    return
  }
}

</mosaic_0001>

<bundles_post_ra>
// kernel: _forward_jit.2
= control target key start
LH: loop header
LB: loop body
LE: loop exit
PB: predicated region body
PF: predicated region fallthrough
CT: control target
= control target key end

     0   :  { %s799_s12 = smov 0   ;;  %s998_s0 = inlined_call_operand.vmem [shape: f32[512,65], index: 0, kind: input, shape index: {}]   ;;  %s999_s1 = inlined_call_operand.vmem [shape: f32[65,128], index: 1, kind: input, shape index: {}]   ;;  %s1000_s2 = inlined_call_operand.vmem [shape: f32[128,128], index: 2, kind: input, shape index: {}]   ;;  %s1001_s3 = inlined_call_operand.vmem [shape: f32[512,128], index: 3, kind: output, shape index: {}]  }
   0x1 LB: > { %s678_s13 = sadd.s32 4294967295, %s777_s12   ;;  %p682_p0 = scmp.ge.s32.totalorder %s777_s12, 1  ;;  %s777_s12 = sphi %s799_s12, %s13_s12  }
   0x2   : > { %p138_p1 = scmp.lt.s32.totalorder %s777_s12, 3 }
   0x4   : > { %p139_p2 = pnand %p682_p0, %p138_p1 }
   0x5   : > { %s683_s18 = sshll.u32 (!%p139_p2), %s678_s13, 5 }
   0x6   : > { %142 = sbr.rel (%p139_p2) target bundleno = 530 (0x212), region = 32  ;;  %p163_p3 = scmp.lt.s32.totalorder (!%p139_p2), %s683_s18, 63 }
   0xb   : > { %v214_v0 = vld [vmem:[%s999_s1 + $0x40] sm:$0x1]  ;;  %vm312_vm0 = vcmask 1040384   ;;  %v213_v1 = vld [vmem:[%s999_s1 + $0x38] sm:$0xff]  ;;  %v212_v2 = vld [vmem:[%s999_s1 + $0x30] sm:$0xff]  ;;  %s1003_s18 = smov (!%p163_p3, %s683_s18), 63 }
   0xc   : > { %687 = vmatpush.msk.msra.mxu0 %vm312_vm0, %v214_v0  ;;  %722 = vmatpush.msk.msra.mxu3 %vm312_vm0, %v214_v0  ;;  %v211_v3 = vld [vmem:[%s999_s1 + $0x28] sm:$0xff]  ;;  %v210_v4 = vld [vmem:[%s999_s1 + $0x20] sm:$0xff]  ;;  %v209_v5 = vld [vmem:[%s999_s1 + $0x18] sm:$0xff]  ;;  %s684_s27 = sshll.u32 %s1003_s18, 3  ;;  %vm215_vm1 = vcmask 531456  }
   0xd   : > { %v208_v6 = vld [vmem:[%s999_s1 + $0x10] sm:$0xff]  ;;  %v207_v7 = vld [vmem:[%s999_s1 + $0x8] sm:$0xff]  ;;  %s839_s7 = scalar_lea.vmem %s998_s0, %s684_s27  ;;  %v206_v8 = vld [vmem:[%s999_s1] sm:$0xff]  ;;  %s961_s22 = scalar_lea.vmem %s1001_s3, %s684_s27 }
   0xe   : > { %324 = vmatpush.msra.mxu0 %v213_v1  ;;  %723 = vmatpush.msra.mxu3 %v213_v1  ;;  %v174_v9 = vld [vmem:[%s839_s7] sm:$0xff]  ;;  %v175_v10 = vld [vmem:[%s839_s7 + $0x8] sm:$0xff]  ;;  %v176_v11 = vld [vmem:[%s839_s7 + $0x10] sm:$0xff] }
   0xf   : > { %v177_v12 = vld [vmem:[%s839_s7 + $0x18] sm:$0xff]  ;;  %v178_v13 = vld [vmem:[%s839_s7 + $0x20] sm:$0xff]  ;;  %v179_v14 = vld [vmem:[%s839_s7 + $0x28] sm:$0xff] }
  0x10   : > { %325 = vmatpush.msra.mxu0 %v212_v2  ;;  %724 = vmatpush.msra.mxu3 %v212_v2  ;;  %v180_v15 = vld [vmem:[%s839_s7 + $0x30] sm:$0xff]  ;;  %v181_v16 = vld [vmem:[%s839_s7 + $0x38] sm:$0xff]  ;;  %v182_v17 = vld [vmem:[%s839_s7 + $0x40] sm:$0xff] }
  0x11   : > { %v476_v18 = vld [vmem:[%s1000_s2 + $0x78] sm:$0xff]  ;;  %v475_v19 = vld [vmem:[%s1000_s2 + $0x70] sm:$0xff]  ;;  %v474_v20 = vld [vmem:[%s1000_s2 + $0x68] sm:$0xff] }
  0x12   : > { %326 = vmatpush.msra.mxu0 %v211_v3  ;;  %725 = vmatpush.msra.mxu3 %v211_v3  ;;  %v473_v21 = vld [vmem:[%s1000_s2 + $0x60] sm:$0xff]  ;;  %v183_v22 = vld [vmem:[%s839_s7 + $0x48] sm:$0xff]  ;;  %v472_v23 = vld [vmem:[%s1000_s2 + $0x58] sm:$0xff] }
  0x13   : > { %477 = vmatpush.msra.mxu1 %v476_v18  ;;  %731 = vmatpush.msra.mxu2 %v476_v18  ;;  %v471_v24 = vld [vmem:[%s1000_s2 + $0x50] sm:$0xff]  ;;  %v470_v25 = vld [vmem:[%s1000_s2 + $0x48] sm:$0xff]  ;;  %v469_v26 = vld [vmem:[%s1000_s2 + $0x40] sm:$0xff] }
  0x14   : > { %327 = vmatpush.msra.mxu0 %v210_v4  ;;  %726 = vmatpush.msra.mxu3 %v210_v4  ;;  %v184_v27 = vld [vmem:[%s839_s7 + $0x50] sm:$0xff]  ;;  %v468_v28 = vld [vmem:[%s1000_s2 + $0x38] sm:$0xff]  ;;  %v466_v30 = vld [vmem:[%s1000_s2 + $0x28] sm:$0xff] }
  0x15   : > { %478 = vmatpush.msra.mxu1 %v475_v19  ;;  %733 = vmatpush.msra.mxu2 %v475_v19  ;;  %v467_v29 = vld [vmem:[%s1000_s2 + $0x30] sm:$0xff]  ;;  %v465_v31 = vld [vmem:[%s1000_s2 + $0x20] sm:$0xff]  ;;  %v185_v32 = vld [vmem:[%s839_s7 + $0x58] sm:$0xff] }
  0x16   : > { %328 = vmatpush.msra.mxu0 %v209_v5  ;;  %727 = vmatpush.msra.mxu3 %v209_v5  ;;  %v464_v33 = vld [vmem:[%s1000_s2 + $0x18] sm:$0xff]  ;;  %v191_v34 = vld [vmem:[%s839_s7 + $0x88] sm:$0xff]  ;;  %v463_v35 = vld [vmem:[%s1000_s2 + $0x10] sm:$0xff] }
  0x17   : > { %479 = vmatpush.msra.mxu1 %v474_v20  ;;  %735 = vmatpush.msra.mxu2 %v474_v20  ;;  %v462_v36 = vld [vmem:[%s1000_s2 + $0x8] sm:$0xff]  ;;  %v186_v37 = vld [vmem:[%s839_s7 + $0x60] sm:$0xff]  ;;  %v192_v39 = vld [vmem:[%s839_s7 + $0x90] sm:$0xff] }
  0x18   : > { %329 = vmatpush.msra.mxu0 %v208_v6  ;;  %728 = vmatpush.msra.mxu3 %v208_v6  ;;  %v461_v38 = vld [vmem:[%s1000_s2] sm:$0xff]  ;;  %v187_v40 = vld [vmem:[%s839_s7 + $0x68] sm:$0xff]  ;;  %v193_v41 = vld [vmem:[%s839_s7 + $0x98] sm:$0xff] }
  0x19   : > { %480 = vmatpush.msra.mxu1 %v473_v21  ;;  %737 = vmatpush.msra.mxu2 %v473_v21  ;;  %v188_v42 = vld [vmem:[%s839_s7 + $0x70] sm:$0xff]  ;;  %v194_v43 = vld [vmem:[%s839_s7 + $0xa0] sm:$0xff]  ;;  %v189_v44 = vld [vmem:[%s839_s7 + $0x78] sm:$0xff] }
  0x1a   : > { %330 = vmatpush.msra.mxu0 %v207_v7  ;;  %729 = vmatpush.msra.mxu3 %v207_v7  ;;  %v195_v45 = vld [vmem:[%s839_s7 + $0xa8] sm:$0xff]  ;;  %v190_v47 = vld [vmem:[%s839_s7 + $0x80] sm:$0xff]  ;;  %v196_v49 = vld [vmem:[%s839_s7 + $0xb0] sm:$0xff] }
  0x1b   : > { %481 = vmatpush.msra.mxu1 %v472_v23  ;;  %739 = vmatpush.msra.mxu2 %v472_v23  ;;  %v197_v52 = vld [vmem:[%s839_s7 + $0xb8] sm:$0xff]  ;;  %v198_v55 = vld [vmem:[%s839_s7 + $0xc0] sm:$0xff]  ;;  %v199_v58 = vld [vmem:[%s839_s7 + $0xc8] sm:$0xff] }
  0x1c   : > { %331 = vmatpush.msra.mxu0 %v206_v8  ;;  %730 = vmatpush.msra.mxu3 %v206_v8  ;;  %v200_v61 = vld [vmem:[%s839_s7 + $0xd0] sm:$0xff]  ;;  %v201_v0 = vld [vmem:[%s839_s7 + $0xd8] sm:$0xff]  ;;  %v202_v3 = vld [vmem:[%s839_s7 + $0xe0] sm:$0xff] }
  0x1d   : > { %688 = vmatmul.msk.f32.vlgmr.msra.gmra.mxu0 %vm215_vm1, %v174_v9  ;;  %482 = vmatpush.msra.mxu1 %v471_v24  ;;  %v203_v6 = vld [vmem:[%s839_s7 + $0xe8] sm:$0xff]  ;;  %v204_v9 = vld [vmem:[%s839_s7 + $0xf0] sm:$0xff] }
  0x1e   : > { %732 = vmatpush.msrb.mxu3 %v476_v18  ;;  %741 = vmatpush.msra.mxu2 %v471_v24 }
  0x1f   : > { %483 = vmatpush.msra.mxu1 %v470_v25  ;;  %705 = vmatmul.msk.f32.vlgmr.msra.gmra.mxu3 %vm215_vm1, %v191_v34 }
  0x20   : > { %734 = vmatpush.msrb.mxu3 %v475_v19  ;;  %743 = vmatpush.msra.mxu2 %v470_v25 }
  0x21   : > { %484 = vmatpush.msra.mxu1 %v469_v26 }
  0x22   : > { %736 = vmatpush.msrb.mxu3 %v474_v20  ;;  %745 = vmatpush.msra.mxu2 %v469_v26 }
  0x23   : > { %485 = vmatpush.msra.mxu1 %v468_v28 }
  0x24   : > { %738 = vmatpush.msrb.mxu3 %v473_v21  ;;  %747 = vmatpush.msra.mxu2 %v468_v28 }
  0x25   : > { %689 = vmatmul.msk.f32.gmra.mxu0 %vm215_vm1, %v175_v10  ;;  %486 = vmatpush.msra.mxu1 %v467_v29 }
  0x26   : > { %740 = vmatpush.msrb.mxu3 %v472_v23  ;;  %749 = vmatpush.msra.mxu2 %v467_v29 }
  0x27   : > { %487 = vmatpush.msra.mxu1 %v466_v30  ;;  %706 = vmatmul.msk.f32.gmra.mxu3 %vm215_vm1, %v192_v39 }
  0x28   : > { %742 = vmatpush.msrb.mxu3 %v471_v24  ;;  %751 = vmatpush.msra.mxu2 %v466_v30 }
  0x29   : > { %488 = vmatpush.msra.mxu1 %v465_v31 }
  0x2a   : > { %744 = vmatpush.msrb.mxu3 %v470_v25  ;;  %753 = vmatpush.msra.mxu2 %v465_v31 }
  0x2b   : > { %489 = vmatpush.msra.mxu1 %v464_v33 }
  0x2c   : > { %746 = vmatpush.msrb.mxu3 %v469_v26  ;;  %755 = vmatpush.msra.mxu2 %v464_v33 }
  0x2d   : > { %690 = vmatmul.msk.f32.gmra.mxu0 %vm215_vm1, %v176_v11  ;;  %490 = vmatpush.msra.mxu1 %v463_v35 }
  0x2e   : > { %748 = vmatpush.msrb.mxu3 %v468_v28  ;;  %757 = vmatpush.msra.mxu2 %v463_v35 }
  0x2f   : > { %491 = vmatpush.msra.mxu1 %v462_v36  ;;  %707 = vmatmul.msk.f32.gmra.mxu3 %vm215_vm1, %v193_v41 }
  0x30   : > { %750 = vmatpush.msrb.mxu3 %v467_v29  ;;  %759 = vmatpush.msra.mxu2 %v462_v36 }
  0x31   : > { %492 = vmatpush.msra.mxu1 %v461_v38 }
  0x32   : > { %752 = vmatpush.msrb.mxu3 %v466_v30  ;;  %761 = vmatpush.msra.mxu2 %v461_v38 }
  0x34   : > { %754 = vmatpush.msrb.mxu3 %v465_v31 }
  0x35   : > { %691 = vmatmul.msk.f32.gmra.mxu0 %vm215_vm1, %v177_v12  ;;  %v205_v12 = vld [vmem:[%s839_s7 + $0xf8] sm:$0xff] }
  0x36   : > { %756 = vmatpush.msrb.mxu3 %v464_v33 }
  0x37   : > { %708 = vmatmul.msk.f32.gmra.mxu3 %vm215_vm1, %v194_v43 }
  0x38   : > { %758 = vmatpush.msrb.mxu3 %v463_v35 }
  0x3a   : > { %760 = vmatpush.msrb.mxu3 %v462_v36 }
  0x3c   : > { %762 = vmatpush.msrb.mxu3 %v461_v38 }
  0x3d   : > { %692 = vmatmul.msk.f32.gmra.mxu0 %vm215_vm1, %v178_v13 }
  0x3f   : > { %709 = vmatmul.msk.f32.gmra.mxu3 %vm215_vm1, %v195_v45 }
  0x45   : > { %693 = vmatmul.msk.f32.gmra.mxu0 %vm215_vm1, %v179_v14 }
  0x47   : > { %710 = vmatmul.msk.f32.gmra.mxu3 %vm215_vm1, %v196_v49 }
  0x4d   : > { %694 = vmatmul.msk.f32.gmra.mxu0 %vm215_vm1, %v180_v15 }
  0x4f   : > { %711 = vmatmul.msk.f32.gmra.mxu3 %vm215_vm1, %v197_v52 }
  0x55   : > { %695 = vmatmul.msk.f32.gmra.mxu0 %vm215_vm1, %v181_v16 }
  0x57   : > { %712 = vmatmul.msk.f32.gmra.mxu3 %vm215_vm1, %v198_v55 }
  0x5d   : > { %696 = vmatmul.msk.f32.gmra.mxu0 %vm215_vm1, %v182_v17 }
  0x5f   : > { %713 = vmatmul.msk.f32.gmra.mxu3 %vm215_vm1, %v199_v58 }
  0x65   : > { %697 = vmatmul.msk.f32.gmra.mxu0 %vm215_vm1, %v183_v22 }
  0x67   : > { %714 = vmatmul.msk.f32.gmra.mxu3 %vm215_vm1, %v200_v61 }
  0x6d   : > { %698 = vmatmul.msk.f32.gmra.mxu0 %vm215_vm1, %v184_v27 }
  0x6f   : > { %715 = vmatmul.msk.f32.gmra.mxu3 %vm215_vm1, %v201_v0 }
  0x75   : > { %699 = vmatmul.msk.f32.gmra.mxu0 %vm215_vm1, %v185_v32 }
  0x77   : > { %716 = vmatmul.msk.f32.gmra.mxu3 %vm215_vm1, %v202_v3 }
  0x7d   : > { %700 = vmatmul.msk.f32.gmra.mxu0 %vm215_vm1, %v186_v37 }
  0x7f   : > { %717 = vmatmul.msk.f32.gmra.mxu3 %vm215_vm1, %v203_v6 }
  0x85   : > { %701 = vmatmul.msk.f32.gmra.mxu0 %vm215_vm1, %v187_v40 }
  0x87   : > { %718 = vmatmul.msk.f32.gmra.mxu3 %vm215_vm1, %v204_v9 }
  0x8d   : > { %702 = vmatmul.msk.f32.gmra.mxu0 %vm215_vm1, %v188_v42 }
  0x8f   : > { %719 = vmatmul.msk.f32.gmra.mxu3 %vm215_vm1, %v205_v12 }
  0x95   : > { %703 = vmatmul.msk.f32.gmra.mxu0 %vm215_vm1, %v189_v44 }
  0x9a   : > { %v333_v46 = vpop.f32.mrf.mxu0 }
  0x9b   : > { %v429_v48 = vmul.f32 %v333_v46, %v333_v46 }
  0x9d   : > { %704 = vmatmul.msk.f32.gmra.mxu0 %vm215_vm1, %v190_v47  ;;  %493 = vmatmul.f32.vlgmr.msra.gmra.mxu1 %v429_v48 }
  0xa2   : > { %v336_v50 = vpop.f32.mrf.mxu0  ;;  %v384_v18 = vpop.f32.mrf.mxu3 }
  0xa3   : > { %v430_v51 = vmul.f32 %v336_v50, %v336_v50  ;;  %v446_v34 = vmul.f32 %v384_v18, %v384_v18 }
  0xa5   : > { %496 = vmatmul.f32.gmra.mxu1 %v430_v51 }
  0xaa   : > { %v339_v53 = vpop.f32.mrf.mxu0  ;;  %v387_v21 = vpop.f32.mrf.mxu3 }
  0xab   : > { %v431_v54 = vmul.f32 %v339_v53, %v339_v53  ;;  %v447_v37 = vmul.f32 %v387_v21, %v387_v21 }
  0xad   : > { %499 = vmatmul.f32.gmra.mxu1 %v431_v54 }
  0xb2   : > { %v342_v56 = vpop.f32.mrf.mxu0  ;;  %v390_v24 = vpop.f32.mrf.mxu3 }
  0xb3   : > { %v432_v57 = vmul.f32 %v342_v56, %v342_v56  ;;  %v448_v40 = vmul.f32 %v390_v24, %v390_v24 }
  0xb5   : > { %502 = vmatmul.f32.gmra.mxu1 %v432_v57 }
  0xba   : > { %v345_v59 = vpop.f32.mrf.mxu0  ;;  %v393_v27 = vpop.f32.mrf.mxu3 }
  0xbb   : > { %v433_v60 = vmul.f32 %v345_v59, %v345_v59  ;;  %v449_v43 = vmul.f32 %v393_v27, %v393_v27 }
  0xbd   : > { %505 = vmatmul.f32.gmra.mxu1 %v433_v60 }
  0xc2   : > { %v348_v62 = vpop.f32.mrf.mxu0  ;;  %v396_v32 = vpop.f32.mrf.mxu3 }
  0xc3   : > { %v434_v63 = vmul.f32 %v348_v62, %v348_v62  ;;  %v450_v46 = vmul.f32 %v396_v32, %v396_v32 }
  0xc5   : > { %508 = vmatmul.f32.gmra.mxu1 %v434_v63 }
  0xca   : > { %v351_v1 = vpop.f32.mrf.mxu0  ;;  %v399_v35 = vpop.f32.mrf.mxu3 }
  0xcb   : > { %v435_v2 = vmul.f32 %v351_v1, %v351_v1  ;;  %v451_v49 = vmul.f32 %v399_v35, %v399_v35 }
  0xcd   : > { %511 = vmatmul.f32.gmra.mxu1 %v435_v2 }
  0xd2   : > { %v354_v4 = vpop.f32.mrf.mxu0  ;;  %v402_v38 = vpop.f32.mrf.mxu3 }
  0xd3   : > { %v436_v5 = vmul.f32 %v354_v4, %v354_v4  ;;  %v452_v52 = vmul.f32 %v402_v38, %v402_v38 }
  0xd5   : > { %514 = vmatmul.f32.gmra.mxu1 %v436_v5 }
  0xda   : > { %v357_v7 = vpop.f32.mrf.mxu0  ;;  %v405_v41 = vpop.f32.mrf.mxu3 }
  0xdb   : > { %v437_v8 = vmul.f32 %v357_v7, %v357_v7  ;;  %v453_v55 = vmul.f32 %v405_v41, %v405_v41 }
  0xdd   : > { %517 = vmatmul.f32.gmra.mxu1 %v437_v8 }
  0xe2   : > { %v360_v10 = vpop.f32.mrf.mxu0  ;;  %v408_v44 = vpop.f32.mrf.mxu3 }
  0xe3   : > { %v438_v11 = vmul.f32 %v360_v10, %v360_v10  ;;  %v454_v58 = vmul.f32 %v408_v44, %v408_v44 }
  0xe5   : > { %520 = vmatmul.f32.gmra.mxu1 %v438_v11 }
  0xea   : > { %v363_v13 = vpop.f32.mrf.mxu0  ;;  %v411_v47 = vpop.f32.mrf.mxu3 }
  0xeb   : > { %v439_v14 = vmul.f32 %v363_v13, %v363_v13  ;;  %v455_v61 = vmul.f32 %v411_v47, %v411_v47 }
  0xed   : > { %523 = vmatmul.f32.gmra.mxu1 %v439_v14 }
  0xf2   : > { %v366_v15 = vpop.f32.mrf.mxu0  ;;  %v414_v50 = vpop.f32.mrf.mxu3 }
  0xf3   : > { %v440_v16 = vmul.f32 %v366_v15, %v366_v15  ;;  %v456_v1 = vmul.f32 %v414_v50, %v414_v50 }
  0xf5   : > { %526 = vmatmul.f32.gmra.mxu1 %v440_v16 }
  0xfa   : > { %v369_v17 = vpop.f32.mrf.mxu0  ;;  %v417_v53 = vpop.f32.mrf.mxu3 }
  0xfb   : > { %v441_v19 = vmul.f32 %v369_v17, %v369_v17  ;;  %v457_v3 = vmul.f32 %v417_v53, %v417_v53 }
  0xfd   : > { %529 = vmatmul.f32.gmra.mxu1 %v441_v19 }
 0x102   : > { %v372_v20 = vpop.f32.mrf.mxu0  ;;  %v420_v56 = vpop.f32.mrf.mxu3 }
 0x103   : > { %v442_v22 = vmul.f32 %v372_v20, %v372_v20  ;;  %v458_v5 = vmul.f32 %v420_v56, %v420_v56 }
 0x105   : > { %532 = vmatmul.f32.gmra.mxu1 %v442_v22 }
 0x10a   : > { %v375_v23 = vpop.f32.mrf.mxu0  ;;  %v423_v59 = vpop.f32.mrf.mxu3 }
 0x10b   : > { %v443_v25 = vmul.f32 %v375_v23, %v375_v23  ;;  %v459_v7 = vmul.f32 %v423_v59, %v423_v59 }
 0x10d   : > { %535 = vmatmul.f32.gmra.mxu1 %v443_v25 }
 0x112   : > { %v378_v26 = vpop.f32.mrf.mxu0  ;;  %v426_v62 = vpop.f32.mrf.mxu3 }
 0x113   : > { %v444_v28 = vmul.f32 %v378_v26, %v378_v26  ;;  %v460_v63 = vmul.f32 %v426_v62, %v426_v62 }
 0x115   : > { %538 = vmatmul.f32.vlgmr.msra.gmra.mxu2 %v444_v28  ;;  %586 = vmatmul.f32.vlgmr.msrb.gmra.mxu3 %v460_v63 }
 0x11a   : > { %v381_v29 = vpop.f32.mrf.mxu0  ;;  %v494_v30 = vpop.f32.mrf.mxu1 }
 0x11b   : > { %v445_v31 = vmul.f32 %v381_v29, %v381_v29  ;;  %590 = vst [vmem:[%s961_s22] sm:$0xff] %v494_v30 }
 0x11d   : > { %541 = vmatmul.f32.gmra.mxu2 %v445_v31 }
 0x122   : > { %v497_v33 = vpop.f32.mrf.mxu1 }
 0x123   : > { %591 = vst [vmem:[%s961_s22 + $0x8] sm:$0xff] %v497_v33 }
 0x125   : > { %544 = vmatmul.f32.gmra.mxu2 %v446_v34 }
 0x12a   : > { %v500_v36 = vpop.f32.mrf.mxu1 }
 0x12b   : > { %592 = vst [vmem:[%s961_s22 + $0x10] sm:$0xff] %v500_v36 }
 0x12d   : > { %547 = vmatmul.f32.gmra.mxu2 %v447_v37 }
 0x132   : > { %v503_v39 = vpop.f32.mrf.mxu1 }
 0x133   : > { %593 = vst [vmem:[%s961_s22 + $0x18] sm:$0xff] %v503_v39 }
 0x135   : > { %550 = vmatmul.f32.gmra.mxu2 %v448_v40 }
 0x13a   : > { %v506_v42 = vpop.f32.mrf.mxu1 }
 0x13b   : > { %594 = vst [vmem:[%s961_s22 + $0x20] sm:$0xff] %v506_v42 }
 0x13d   : > { %553 = vmatmul.f32.gmra.mxu2 %v449_v43 }
 0x142   : > { %v509_v45 = vpop.f32.mrf.mxu1 }
 0x143   : > { %595 = vst [vmem:[%s961_s22 + $0x28] sm:$0xff] %v509_v45 }
 0x145   : > { %556 = vmatmul.f32.gmra.mxu2 %v450_v46 }
 0x14a   : > { %v512_v48 = vpop.f32.mrf.mxu1 }
 0x14b   : > { %596 = vst [vmem:[%s961_s22 + $0x30] sm:$0xff] %v512_v48 }
 0x14d   : > { %559 = vmatmul.f32.gmra.mxu2 %v451_v49 }
 0x152   : > { %v515_v51 = vpop.f32.mrf.mxu1 }
 0x153   : > { %597 = vst [vmem:[%s961_s22 + $0x38] sm:$0xff] %v515_v51 }
 0x155   : > { %562 = vmatmul.f32.gmra.mxu2 %v452_v52 }
 0x15a   : > { %v518_v54 = vpop.f32.mrf.mxu1 }
 0x15b   : > { %598 = vst [vmem:[%s961_s22 + $0x40] sm:$0xff] %v518_v54 }
 0x15d   : > { %565 = vmatmul.f32.gmra.mxu2 %v453_v55 }
 0x162   : > { %v521_v57 = vpop.f32.mrf.mxu1 }
 0x163   : > { %599 = vst [vmem:[%s961_s22 + $0x48] sm:$0xff] %v521_v57 }
 0x165   : > { %568 = vmatmul.f32.gmra.mxu2 %v454_v58 }
 0x16a   : > { %v524_v60 = vpop.f32.mrf.mxu1 }
 0x16b   : > { %600 = vst [vmem:[%s961_s22 + $0x50] sm:$0xff] %v524_v60 }
 0x16d   : > { %571 = vmatmul.f32.gmra.mxu2 %v455_v61 }
 0x172   : > { %v527_v0 = vpop.f32.mrf.mxu1 }
 0x173   : > { %601 = vst [vmem:[%s961_s22 + $0x58] sm:$0xff] %v527_v0 }
 0x175   : > { %574 = vmatmul.f32.gmra.mxu2 %v456_v1 }
 0x17a   : > { %v530_v2 = vpop.f32.mrf.mxu1 }
 0x17b   : > { %602 = vst [vmem:[%s961_s22 + $0x60] sm:$0xff] %v530_v2 }
 0x17d   : > { %577 = vmatmul.f32.gmra.mxu2 %v457_v3 }
 0x182   : > { %v533_v4 = vpop.f32.mrf.mxu1 }
 0x183   : > { %603 = vst [vmem:[%s961_s22 + $0x68] sm:$0xff] %v533_v4 }
 0x185   : > { %580 = vmatmul.f32.gmra.mxu2 %v458_v5 }
 0x18a   : > { %v536_v6 = vpop.f32.mrf.mxu1 }
 0x18b   : > { %604 = vst [vmem:[%s961_s22 + $0x70] sm:$0xff] %v536_v6 }
 0x18d   : > { %583 = vmatmul.f32.gmra.mxu2 %v459_v7 }
 0x198   : > { %v539_v8 = vpop.f32.mrf.mxu2  ;;  %v587_v20 = vpop.f32.mrf.mxu3 }
 0x199   : > { %605 = vst [vmem:[%s961_s22 + $0x78] sm:$0xff] %v539_v8 }
 0x19a   : > { %621 = vst [vmem:[%s961_s22 + $0xf8] sm:$0xff] %v587_v20 }
 0x1a0   : > { %v542_v9 = vpop.f32.mrf.mxu2 }
 0x1a1   : > { %606 = vst [vmem:[%s961_s22 + $0x80] sm:$0xff] %v542_v9 }
 0x1a8   : > { %v545_v10 = vpop.f32.mrf.mxu2 }
 0x1a9   : > { %607 = vst [vmem:[%s961_s22 + $0x88] sm:$0xff] %v545_v10 }
 0x1b0   : > { %v548_v11 = vpop.f32.mrf.mxu2 }
 0x1b1   : > { %608 = vst [vmem:[%s961_s22 + $0x90] sm:$0xff] %v548_v11 }
 0x1b8   : > { %v551_v12 = vpop.f32.mrf.mxu2 }
 0x1b9   : > { %609 = vst [vmem:[%s961_s22 + $0x98] sm:$0xff] %v551_v12 }
 0x1c0   : > { %v554_v13 = vpop.f32.mrf.mxu2 }
 0x1c1   : > { %610 = vst [vmem:[%s961_s22 + $0xa0] sm:$0xff] %v554_v13 }
 0x1c8   : > { %v557_v14 = vpop.f32.mrf.mxu2 }
 0x1c9   : > { %611 = vst [vmem:[%s961_s22 + $0xa8] sm:$0xff] %v557_v14 }
 0x1d0   : > { %v560_v15 = vpop.f32.mrf.mxu2 }
 0x1d1   : > { %612 = vst [vmem:[%s961_s22 + $0xb0] sm:$0xff] %v560_v15 }
 0x1d8   : > { %v563_v16 = vpop.f32.mrf.mxu2 }
 0x1d9   : > { %613 = vst [vmem:[%s961_s22 + $0xb8] sm:$0xff] %v563_v16 }
 0x1e0   : > { %v566_v17 = vpop.f32.mrf.mxu2 }
 0x1e1   : > { %614 = vst [vmem:[%s961_s22 + $0xc0] sm:$0xff] %v566_v17 }
 0x1e8   : > { %v569_v18 = vpop.f32.mrf.mxu2 }
 0x1e9   : > { %615 = vst [vmem:[%s961_s22 + $0xc8] sm:$0xff] %v569_v18 }
 0x1f0   : > { %v572_v19 = vpop.f32.mrf.mxu2 }
 0x1f1   : > { %616 = vst [vmem:[%s961_s22 + $0xd0] sm:$0xff] %v572_v19 }
 0x1f8   : > { %v575_v21 = vpop.f32.mrf.mxu2 }
 0x1f9   : > { %617 = vst [vmem:[%s961_s22 + $0xd8] sm:$0xff] %v575_v21 }
 0x200   : > { %v578_v22 = vpop.f32.mrf.mxu2 }
 0x201   : > { %618 = vst [vmem:[%s961_s22 + $0xe0] sm:$0xff] %v578_v22 }
 0x208   : > { %v581_v23 = vpop.f32.mrf.mxu2 }
 0x209   : > { %619 = vst [vmem:[%s961_s22 + $0xe8] sm:$0xff] %v581_v23 }
 0x210   : > { %v584_v24 = vpop.f32.mrf.mxu2 }
 0x211   : > { %620 = vst [vmem:[%s961_s22 + $0xf0] sm:$0xff] %v584_v24 }
 0x212 PF: > { %s13_s12 = sadd.s32 1, %s777_s12  }
 0x213   : > { %p10_p4 = scmp.ge.s32.totalorder %s13_s12, 4  }
 0x215   :  { %12 = sbr.rel (!%p10_p4) target bundleno = 1 (0x1), region = 62 }

// kernel: _forward_jit.3
= control target key start
LH: loop header
LB: loop body
LE: loop exit
PB: predicated region body
PF: predicated region fallthrough
CT: control target
= control target key end

     0   :  { %s2690_s1 = inlined_call_operand.vmem [shape: f32[3840,128], index: 1, kind: input, shape index: {}]   ;;  %s2691_s0 = inlined_call_operand.vmem [shape: f32[8,3840], index: 0, kind: input, shape index: {}]   ;;  %s2692_s2 = inlined_call_operand.vmem [shape: f32[1,128], index: 2, kind: input, shape index: {}]   ;;  %s2693_s3 = inlined_call_operand.vmem [shape: f32[8,128], index: 3, kind: output, shape index: {}]  }
   0x1   :  { %v59_v0 = vld [vmem:[%s2690_s1 + $0x78] sm:$0xff]  ;;  %v58_v2 = vld [vmem:[%s2690_s1 + $0x70] sm:$0xff]  ;;  %v57_v6 = vld [vmem:[%s2690_s1 + $0x68] sm:$0xff] }
   0x2   :  { %v91_v1 = vld [vmem:[%s2690_s1 + $0x178] sm:$0xff]  ;;  %528 = vmatpush.msra.mxu0 %v59_v0  ;;  %v90_v4 = vld [vmem:[%s2690_s1 + $0x170] sm:$0xff]  ;;  %v89_v8 = vld [vmem:[%s2690_s1 + $0x168] sm:$0xff] }
   0x3   :  { %568 = vmatpush.msra.mxu2 %v91_v1  ;;  %v75_v3 = vld [vmem:[%s2690_s1 + $0xf8] sm:$0xff]  ;;  %v74_v7 = vld [vmem:[%s2690_s1 + $0xf0] sm:$0xff]  ;;  %v73_v10 = vld [vmem:[%s2690_s1 + $0xe8] sm:$0xff] }
   0x4   :  { %v107_v5 = vld [vmem:[%s2690_s1 + $0x1f8] sm:$0xff]  ;;  %548 = vmatpush.msra.mxu1 %v75_v3  ;;  %529 = vmatpush.msra.mxu0 %v58_v2  ;;  %v106_v9 = vld [vmem:[%s2690_s1 + $0x1f0] sm:$0xff]  ;;  %v56_v11 = vld [vmem:[%s2690_s1 + $0x60] sm:$0xff] }
   0x5   :  { %588 = vmatpush.msra.mxu3 %v107_v5  ;;  %569 = vmatpush.msra.mxu2 %v90_v4  ;;  %v88_v12 = vld [vmem:[%s2690_s1 + $0x160] sm:$0xff]  ;;  %v105_v13 = vld [vmem:[%s2690_s1 + $0x1e8] sm:$0xff]  ;;  %v55_v16 = vld [vmem:[%s2690_s1 + $0x58] sm:$0xff] }
   0x6   :  { %549 = vmatpush.msra.mxu1 %v74_v7  ;;  %530 = vmatpush.msra.mxu0 %v57_v6  ;;  %v72_v14 = vld [vmem:[%s2690_s1 + $0xe0] sm:$0xff]  ;;  %v87_v17 = vld [vmem:[%s2690_s1 + $0x158] sm:$0xff]  ;;  %v54_v20 = vld [vmem:[%s2690_s1 + $0x50] sm:$0xff] }
   0x7   :  { %589 = vmatpush.msra.mxu3 %v106_v9  ;;  %570 = vmatpush.msra.mxu2 %v89_v8  ;;  %v104_v15 = vld [vmem:[%s2690_s1 + $0x1e0] sm:$0xff]  ;;  %v71_v18 = vld [vmem:[%s2690_s1 + $0xd8] sm:$0xff]  ;;  %v86_v21 = vld [vmem:[%s2690_s1 + $0x150] sm:$0xff] }
   0x8   :  { %550 = vmatpush.msra.mxu1 %v73_v10  ;;  %531 = vmatpush.msra.mxu0 %v56_v11  ;;  %v103_v19 = vld [vmem:[%s2690_s1 + $0x1d8] sm:$0xff]  ;;  %v70_v22 = vld [vmem:[%s2690_s1 + $0xd0] sm:$0xff]  ;;  %v53_v24 = vld [vmem:[%s2690_s1 + $0x48] sm:$0xff] }
   0x9   :  { %590 = vmatpush.msra.mxu3 %v105_v13  ;;  %571 = vmatpush.msra.mxu2 %v88_v12  ;;  %v102_v23 = vld [vmem:[%s2690_s1 + $0x1d0] sm:$0xff]  ;;  %v85_v25 = vld [vmem:[%s2690_s1 + $0x148] sm:$0xff]  ;;  %v52_v28 = vld [vmem:[%s2690_s1 + $0x40] sm:$0xff] }
   0xa   :  { %551 = vmatpush.msra.mxu1 %v72_v14  ;;  %532 = vmatpush.msra.mxu0 %v55_v16  ;;  %v69_v26 = vld [vmem:[%s2690_s1 + $0xc8] sm:$0xff]  ;;  %v84_v29 = vld [vmem:[%s2690_s1 + $0x140] sm:$0xff]  ;;  %v51_v32 = vld [vmem:[%s2690_s1 + $0x38] sm:$0xff] }
   0xb   :  { %591 = vmatpush.msra.mxu3 %v104_v15  ;;  %572 = vmatpush.msra.mxu2 %v87_v17  ;;  %v101_v27 = vld [vmem:[%s2690_s1 + $0x1c8] sm:$0xff]  ;;  %v68_v30 = vld [vmem:[%s2690_s1 + $0xc0] sm:$0xff]  ;;  %v83_v33 = vld [vmem:[%s2690_s1 + $0x138] sm:$0xff] }
   0xc   :  { %552 = vmatpush.msra.mxu1 %v71_v18  ;;  %533 = vmatpush.msra.mxu0 %v54_v20  ;;  %v100_v31 = vld [vmem:[%s2690_s1 + $0x1c0] sm:$0xff]  ;;  %v67_v34 = vld [vmem:[%s2690_s1 + $0xb8] sm:$0xff]  ;;  %v50_v36 = vld [vmem:[%s2690_s1 + $0x30] sm:$0xff] }
   0xd   :  { %592 = vmatpush.msra.mxu3 %v103_v19  ;;  %573 = vmatpush.msra.mxu2 %v86_v21  ;;  %v99_v35 = vld [vmem:[%s2690_s1 + $0x1b8] sm:$0xff]  ;;  %v82_v37 = vld [vmem:[%s2690_s1 + $0x130] sm:$0xff]  ;;  %v49_v40 = vld [vmem:[%s2690_s1 + $0x28] sm:$0xff] }
   0xe   :  { %553 = vmatpush.msra.mxu1 %v70_v22  ;;  %534 = vmatpush.msra.mxu0 %v53_v24  ;;  %v66_v38 = vld [vmem:[%s2690_s1 + $0xb0] sm:$0xff]  ;;  %v81_v41 = vld [vmem:[%s2690_s1 + $0x128] sm:$0xff]  ;;  %v48_v44 = vld [vmem:[%s2690_s1 + $0x20] sm:$0xff] }
   0xf   :  { %593 = vmatpush.msra.mxu3 %v102_v23  ;;  %574 = vmatpush.msra.mxu2 %v85_v25  ;;  %v98_v39 = vld [vmem:[%s2690_s1 + $0x1b0] sm:$0xff]  ;;  %v65_v42 = vld [vmem:[%s2690_s1 + $0xa8] sm:$0xff]  ;;  %v80_v45 = vld [vmem:[%s2690_s1 + $0x120] sm:$0xff] }
  0x10   :  { %554 = vmatpush.msra.mxu1 %v69_v26  ;;  %535 = vmatpush.msra.mxu0 %v52_v28  ;;  %v97_v43 = vld [vmem:[%s2690_s1 + $0x1a8] sm:$0xff]  ;;  %v64_v46 = vld [vmem:[%s2690_s1 + $0xa0] sm:$0xff]  ;;  %v47_v48 = vld [vmem:[%s2690_s1 + $0x18] sm:$0xff] }
  0x11   :  { %594 = vmatpush.msra.mxu3 %v101_v27  ;;  %575 = vmatpush.msra.mxu2 %v84_v29  ;;  %v96_v47 = vld [vmem:[%s2690_s1 + $0x1a0] sm:$0xff]  ;;  %v79_v49 = vld [vmem:[%s2690_s1 + $0x118] sm:$0xff]  ;;  %v46_v52 = vld [vmem:[%s2690_s1 + $0x10] sm:$0xff] }
  0x12   :  { %555 = vmatpush.msra.mxu1 %v68_v30  ;;  %536 = vmatpush.msra.mxu0 %v51_v32  ;;  %v63_v50 = vld [vmem:[%s2690_s1 + $0x98] sm:$0xff]  ;;  %v78_v53 = vld [vmem:[%s2690_s1 + $0x110] sm:$0xff]  ;;  %v45_v56 = vld [vmem:[%s2690_s1 + $0x8] sm:$0xff] }
  0x13   :  { %595 = vmatpush.msra.mxu3 %v100_v31  ;;  %576 = vmatpush.msra.mxu2 %v83_v33  ;;  %v95_v51 = vld [vmem:[%s2690_s1 + $0x198] sm:$0xff]  ;;  %v62_v54 = vld [vmem:[%s2690_s1 + $0x90] sm:$0xff]  ;;  %v77_v57 = vld [vmem:[%s2690_s1 + $0x108] sm:$0xff] }
  0x14   :  { %556 = vmatpush.msra.mxu1 %v67_v34  ;;  %537 = vmatpush.msra.mxu0 %v50_v36  ;;  %v94_v55 = vld [vmem:[%s2690_s1 + $0x190] sm:$0xff]  ;;  %v61_v58 = vld [vmem:[%s2690_s1 + $0x88] sm:$0xff]  ;;  %v44_v60 = vld [vmem:[%s2690_s1] sm:$0xff] }
  0x15   :  { %596 = vmatpush.msra.mxu3 %v99_v35  ;;  %577 = vmatpush.msra.mxu2 %v82_v37  ;;  %v93_v59 = vld [vmem:[%s2690_s1 + $0x188] sm:$0xff]  ;;  %v76_v61 = vld [vmem:[%s2690_s1 + $0x100] sm:$0xff]  ;;  %v123_v62 = vld [vmem:[%s2690_s1 + $0x278] sm:$0xff] }
  0x16   :  { %557 = vmatpush.msra.mxu1 %v66_v38  ;;  %538 = vmatpush.msra.mxu0 %v49_v40  ;;  %v155_v63 = vld [vmem:[%s2690_s1 + $0x378] sm:$0xff]  ;;  %v60_v0 = vld [vmem:[%s2690_s1 + $0x80] sm:$0xff]  ;;  %v122_v2 = vld [vmem:[%s2690_s1 + $0x270] sm:$0xff] }
  0x17   :  { %597 = vmatpush.msra.mxu3 %v98_v39  ;;  %578 = vmatpush.msra.mxu2 %v81_v41  ;;  %v92_v1 = vld [vmem:[%s2690_s1 + $0x180] sm:$0xff]  ;;  %v139_v3 = vld [vmem:[%s2690_s1 + $0x2f8] sm:$0xff]  ;;  %v154_v4 = vld [vmem:[%s2690_s1 + $0x370] sm:$0xff] }
  0x18   :  { %558 = vmatpush.msra.mxu1 %v65_v42  ;;  %539 = vmatpush.msra.mxu0 %v48_v44  ;;  %v171_v5 = vld [vmem:[%s2690_s1 + $0x3f8] sm:$0xff]  ;;  %v121_v6 = vld [vmem:[%s2690_s1 + $0x268] sm:$0xff]  ;;  %v138_v7 = vld [vmem:[%s2690_s1 + $0x2f0] sm:$0xff] }
  0x19   :  { %598 = vmatpush.msra.mxu3 %v97_v43  ;;  %579 = vmatpush.msra.mxu2 %v80_v45  ;;  %v153_v8 = vld [vmem:[%s2690_s1 + $0x368] sm:$0xff]  ;;  %v170_v9 = vld [vmem:[%s2690_s1 + $0x3f0] sm:$0xff]  ;;  %v120_v10 = vld [vmem:[%s2690_s1 + $0x260] sm:$0xff] }
  0x1a   :  { %559 = vmatpush.msra.mxu1 %v64_v46  ;;  %540 = vmatpush.msra.mxu0 %v47_v48  ;;  %v137_v11 = vld [vmem:[%s2690_s1 + $0x2e8] sm:$0xff]  ;;  %v152_v12 = vld [vmem:[%s2690_s1 + $0x360] sm:$0xff]  ;;  %v119_v14 = vld [vmem:[%s2690_s1 + $0x258] sm:$0xff] }
  0x1b   :  { %599 = vmatpush.msra.mxu3 %v96_v47  ;;  %580 = vmatpush.msra.mxu2 %v79_v49  ;;  %v169_v13 = vld [vmem:[%s2690_s1 + $0x3e8] sm:$0xff]  ;;  %v136_v15 = vld [vmem:[%s2690_s1 + $0x2e0] sm:$0xff]  ;;  %v151_v16 = vld [vmem:[%s2690_s1 + $0x358] sm:$0xff] }
  0x1c   :  { %560 = vmatpush.msra.mxu1 %v63_v50  ;;  %541 = vmatpush.msra.mxu0 %v46_v52  ;;  %v168_v17 = vld [vmem:[%s2690_s1 + $0x3e0] sm:$0xff]  ;;  %v118_v18 = vld [vmem:[%s2690_s1 + $0x250] sm:$0xff]  ;;  %v135_v19 = vld [vmem:[%s2690_s1 + $0x2d8] sm:$0xff] }
  0x1d   :  { %600 = vmatpush.msra.mxu3 %v95_v51  ;;  %581 = vmatpush.msra.mxu2 %v78_v53  ;;  %v150_v20 = vld [vmem:[%s2690_s1 + $0x350] sm:$0xff]  ;;  %v167_v21 = vld [vmem:[%s2690_s1 + $0x3d8] sm:$0xff]  ;;  %v117_v22 = vld [vmem:[%s2690_s1 + $0x248] sm:$0xff] }
  0x1e   :  { %561 = vmatpush.msra.mxu1 %v62_v54  ;;  %542 = vmatpush.msra.mxu0 %v45_v56  ;;  %v134_v23 = vld [vmem:[%s2690_s1 + $0x2d0] sm:$0xff]  ;;  %v149_v24 = vld [vmem:[%s2690_s1 + $0x348] sm:$0xff]  ;;  %v116_v26 = vld [vmem:[%s2690_s1 + $0x240] sm:$0xff] }
  0x1f   :  { %601 = vmatpush.msra.mxu3 %v94_v55  ;;  %582 = vmatpush.msra.mxu2 %v77_v57  ;;  %v166_v25 = vld [vmem:[%s2690_s1 + $0x3d0] sm:$0xff]  ;;  %v133_v27 = vld [vmem:[%s2690_s1 + $0x2c8] sm:$0xff]  ;;  %v148_v28 = vld [vmem:[%s2690_s1 + $0x340] sm:$0xff] }
  0x20   :  { %562 = vmatpush.msra.mxu1 %v61_v58  ;;  %543 = vmatpush.msra.mxu0 %v44_v60  ;;  %v165_v29 = vld [vmem:[%s2690_s1 + $0x3c8] sm:$0xff]  ;;  %v115_v30 = vld [vmem:[%s2690_s1 + $0x238] sm:$0xff]  ;;  %v132_v31 = vld [vmem:[%s2690_s1 + $0x2c0] sm:$0xff] }
  0x21   :  { %602 = vmatpush.msra.mxu3 %v93_v59  ;;  %583 = vmatpush.msra.mxu2 %v76_v61  ;;  %v147_v32 = vld [vmem:[%s2690_s1 + $0x338] sm:$0xff]  ;;  %v164_v33 = vld [vmem:[%s2690_s1 + $0x3c0] sm:$0xff]  ;;  %v114_v34 = vld [vmem:[%s2690_s1 + $0x230] sm:$0xff] }
  0x22   :  { %608 = vmatpush.msrb.mxu0 %v123_v62  ;;  %563 = vmatpush.msra.mxu1 %v60_v0  ;;  %v131_v35 = vld [vmem:[%s2690_s1 + $0x2b8] sm:$0xff]  ;;  %v146_v36 = vld [vmem:[%s2690_s1 + $0x330] sm:$0xff]  ;;  %v113_v38 = vld [vmem:[%s2690_s1 + $0x228] sm:$0xff] }
  0x23   :  { %648 = vmatpush.msrb.mxu2 %v155_v63  ;;  %603 = vmatpush.msra.mxu3 %v92_v1  ;;  %v163_v37 = vld [vmem:[%s2690_s1 + $0x3b8] sm:$0xff]  ;;  %v130_v39 = vld [vmem:[%s2690_s1 + $0x2b0] sm:$0xff]  ;;  %v145_v40 = vld [vmem:[%s2690_s1 + $0x328] sm:$0xff] }
  0x24   :  { %609 = vmatpush.msrb.mxu0 %v122_v2  ;;  %628 = vmatpush.msrb.mxu1 %v139_v3  ;;  %v162_v41 = vld [vmem:[%s2690_s1 + $0x3b0] sm:$0xff]  ;;  %v112_v42 = vld [vmem:[%s2690_s1 + $0x220] sm:$0xff]  ;;  %v129_v43 = vld [vmem:[%s2690_s1 + $0x2a8] sm:$0xff] }
  0x25   :  { %649 = vmatpush.msrb.mxu2 %v154_v4  ;;  %668 = vmatpush.msrb.mxu3 %v171_v5  ;;  %v144_v44 = vld [vmem:[%s2690_s1 + $0x320] sm:$0xff]  ;;  %v161_v45 = vld [vmem:[%s2690_s1 + $0x3a8] sm:$0xff]  ;;  %v111_v46 = vld [vmem:[%s2690_s1 + $0x218] sm:$0xff] }
  0x26   :  { %610 = vmatpush.msrb.mxu0 %v121_v6  ;;  %629 = vmatpush.msrb.mxu1 %v138_v7  ;;  %v128_v47 = vld [vmem:[%s2690_s1 + $0x2a0] sm:$0xff]  ;;  %v143_v48 = vld [vmem:[%s2690_s1 + $0x318] sm:$0xff]  ;;  %v110_v50 = vld [vmem:[%s2690_s1 + $0x210] sm:$0xff] }
  0x27   :  { %650 = vmatpush.msrb.mxu2 %v153_v8  ;;  %669 = vmatpush.msrb.mxu3 %v170_v9  ;;  %v160_v49 = vld [vmem:[%s2690_s1 + $0x3a0] sm:$0xff]  ;;  %v127_v51 = vld [vmem:[%s2690_s1 + $0x298] sm:$0xff]  ;;  %v142_v52 = vld [vmem:[%s2690_s1 + $0x310] sm:$0xff] }
  0x28   :  { %611 = vmatpush.msrb.mxu0 %v120_v10  ;;  %630 = vmatpush.msrb.mxu1 %v137_v11  ;;  %v159_v53 = vld [vmem:[%s2690_s1 + $0x398] sm:$0xff]  ;;  %v109_v54 = vld [vmem:[%s2690_s1 + $0x208] sm:$0xff]  ;;  %v126_v55 = vld [vmem:[%s2690_s1 + $0x290] sm:$0xff] }
  0x29   :  { %651 = vmatpush.msrb.mxu2 %v152_v12  ;;  %670 = vmatpush.msrb.mxu3 %v169_v13  ;;  %v141_v56 = vld [vmem:[%s2690_s1 + $0x308] sm:$0xff]  ;;  %v158_v57 = vld [vmem:[%s2690_s1 + $0x390] sm:$0xff]  ;;  %v108_v59 = vld [vmem:[%s2690_s1 + $0x200] sm:$0xff] }
  0x2a   :  { %612 = vmatpush.msrb.mxu0 %v119_v14  ;;  %631 = vmatpush.msrb.mxu1 %v136_v15  ;;  %v16_v58 = vld [vmem:[%s2691_s0 + $0x10] sm:$0xff]  ;;  %v125_v60 = vld [vmem:[%s2690_s1 + $0x288] sm:$0xff]  ;;  %v140_v61 = vld [vmem:[%s2690_s1 + $0x300] sm:$0xff] }
  0x2b   :  { %652 = vmatpush.msrb.mxu2 %v151_v16  ;;  %671 = vmatpush.msrb.mxu3 %v168_v17  ;;  %v157_v62 = vld [vmem:[%s2690_s1 + $0x388] sm:$0xff]  ;;  %v14_v63 = vld [vmem:[%s2691_s0] sm:$0xff]  ;;  %v17_v0 = vld [vmem:[%s2691_s0 + $0x18] sm:$0xff] }
  0x2c   :  { %613 = vmatpush.msrb.mxu0 %v118_v18  ;;  %632 = vmatpush.msrb.mxu1 %v135_v19  ;;  %v187_v1 = vld [vmem:[%s2690_s1 + $0x478] sm:$0xff]  ;;  %v124_v3 = vld [vmem:[%s2690_s1 + $0x280] sm:$0xff]  ;;  %v15_v5 = vld [vmem:[%s2691_s0 + $0x8] sm:$0xff] }
  0x2d   :  { %653 = vmatpush.msrb.mxu2 %v150_v20  ;;  %672 = vmatpush.msrb.mxu3 %v167_v21  ;;  %v219_v2 = vld [vmem:[%s2690_s1 + $0x578] sm:$0xff]  ;;  %v156_v4 = vld [vmem:[%s2690_s1 + $0x380] sm:$0xff]  ;;  %v186_v6 = vld [vmem:[%s2690_s1 + $0x470] sm:$0xff] }
  0x2e   :  { %614 = vmatpush.msrb.mxu0 %v117_v22  ;;  %633 = vmatpush.msrb.mxu1 %v134_v23  ;;  %v203_v7 = vld [vmem:[%s2690_s1 + $0x4f8] sm:$0xff]  ;;  %v218_v8 = vld [vmem:[%s2690_s1 + $0x570] sm:$0xff]  ;;  %v185_v10 = vld [vmem:[%s2690_s1 + $0x468] sm:$0xff] }
  0x2f   :  { %654 = vmatpush.msrb.mxu2 %v149_v24  ;;  %673 = vmatpush.msrb.mxu3 %v166_v25  ;;  %v235_v9 = vld [vmem:[%s2690_s1 + $0x5f8] sm:$0xff]  ;;  %v202_v11 = vld [vmem:[%s2690_s1 + $0x4f0] sm:$0xff]  ;;  %v217_v12 = vld [vmem:[%s2690_s1 + $0x568] sm:$0xff] }
  0x30   :  { %615 = vmatpush.msrb.mxu0 %v116_v26  ;;  %634 = vmatpush.msrb.mxu1 %v133_v27  ;;  %v234_v13 = vld [vmem:[%s2690_s1 + $0x5f0] sm:$0xff]  ;;  %v184_v15 = vld [vmem:[%s2690_s1 + $0x460] sm:$0xff]  ;;  %v201_v16 = vld [vmem:[%s2690_s1 + $0x4e8] sm:$0xff] }
  0x31   :  { %655 = vmatpush.msrb.mxu2 %v148_v28  ;;  %674 = vmatpush.msrb.mxu3 %v165_v29  ;;  %v20_v14 = vld [vmem:[%s2691_s0 + $0x30] sm:$0xff]  ;;  %v216_v17 = vld [vmem:[%s2690_s1 + $0x560] sm:$0xff]  ;;  %v233_v18 = vld [vmem:[%s2690_s1 + $0x5e8] sm:$0xff] }
  0x32   :  { %616 = vmatpush.msrb.mxu0 %v115_v30  ;;  %635 = vmatpush.msrb.mxu1 %v132_v31  ;;  %v18_v19 = vld [vmem:[%s2691_s0 + $0x20] sm:$0xff]  ;;  %v21_v20 = vld [vmem:[%s2691_s0 + $0x38] sm:$0xff]  ;;  %v19_v25 = vld [vmem:[%s2691_s0 + $0x28] sm:$0xff] }
  0x33   :  { %656 = vmatpush.msrb.mxu2 %v147_v32  ;;  %675 = vmatpush.msrb.mxu3 %v164_v33  ;;  %v183_v21 = vld [vmem:[%s2690_s1 + $0x458] sm:$0xff]  ;;  %v200_v22 = vld [vmem:[%s2690_s1 + $0x4e0] sm:$0xff]  ;;  %v182_v26 = vld [vmem:[%s2690_s1 + $0x450] sm:$0xff] }
  0x34   :  { %617 = vmatpush.msrb.mxu0 %v114_v34  ;;  %636 = vmatpush.msrb.mxu1 %v131_v35  ;;  %v215_v23 = vld [vmem:[%s2690_s1 + $0x558] sm:$0xff]  ;;  %v232_v24 = vld [vmem:[%s2690_s1 + $0x5e0] sm:$0xff]  ;;  %v214_v28 = vld [vmem:[%s2690_s1 + $0x550] sm:$0xff] }
  0x35   :  { %657 = vmatpush.msrb.mxu2 %v146_v36  ;;  %676 = vmatpush.msrb.mxu3 %v163_v37  ;;  %v199_v27 = vld [vmem:[%s2690_s1 + $0x4d8] sm:$0xff]  ;;  %v181_v30 = vld [vmem:[%s2690_s1 + $0x448] sm:$0xff]  ;;  %v198_v31 = vld [vmem:[%s2690_s1 + $0x4d0] sm:$0xff] }
  0x36   :  { %618 = vmatpush.msrb.mxu0 %v113_v38  ;;  %637 = vmatpush.msrb.mxu1 %v130_v39  ;;  %v231_v29 = vld [vmem:[%s2690_s1 + $0x5d8] sm:$0xff]  ;;  %v213_v32 = vld [vmem:[%s2690_s1 + $0x548] sm:$0xff]  ;;  %v230_v33 = vld [vmem:[%s2690_s1 + $0x5d0] sm:$0xff] }
  0x37   :  { %658 = vmatpush.msrb.mxu2 %v145_v40  ;;  %677 = vmatpush.msrb.mxu3 %v162_v41  ;;  %v180_v34 = vld [vmem:[%s2690_s1 + $0x440] sm:$0xff]  ;;  %v197_v35 = vld [vmem:[%s2690_s1 + $0x4c8] sm:$0xff]  ;;  %v179_v38 = vld [vmem:[%s2690_s1 + $0x438] sm:$0xff] }
  0x38   :  { %619 = vmatpush.msrb.mxu0 %v112_v42  ;;  %638 = vmatpush.msrb.mxu1 %v129_v43  ;;  %v212_v36 = vld [vmem:[%s2690_s1 + $0x540] sm:$0xff]  ;;  %v229_v37 = vld [vmem:[%s2690_s1 + $0x5c8] sm:$0xff]  ;;  %v211_v40 = vld [vmem:[%s2690_s1 + $0x538] sm:$0xff] }
  0x39   :  { %659 = vmatpush.msrb.mxu2 %v144_v44  ;;  %678 = vmatpush.msrb.mxu3 %v161_v45  ;;  %v196_v39 = vld [vmem:[%s2690_s1 + $0x4c0] sm:$0xff]  ;;  %v178_v42 = vld [vmem:[%s2690_s1 + $0x430] sm:$0xff]  ;;  %v195_v43 = vld [vmem:[%s2690_s1 + $0x4b8] sm:$0xff] }
  0x3a   :  { %620 = vmatpush.msrb.mxu0 %v111_v46  ;;  %639 = vmatpush.msrb.mxu1 %v128_v47  ;;  %v228_v41 = vld [vmem:[%s2690_s1 + $0x5c0] sm:$0xff]  ;;  %v210_v44 = vld [vmem:[%s2690_s1 + $0x530] sm:$0xff]  ;;  %v227_v45 = vld [vmem:[%s2690_s1 + $0x5b8] sm:$0xff] }
  0x3b   :  { %660 = vmatpush.msrb.mxu2 %v143_v48  ;;  %679 = vmatpush.msrb.mxu3 %v160_v49  ;;  %v177_v46 = vld [vmem:[%s2690_s1 + $0x428] sm:$0xff]  ;;  %v194_v47 = vld [vmem:[%s2690_s1 + $0x4b0] sm:$0xff] }
  0x3c   :  { %621 = vmatpush.msrb.mxu0 %v110_v50  ;;  %640 = vmatpush.msrb.mxu1 %v127_v51  ;;  %v209_v48 = vld [vmem:[%s2690_s1 + $0x528] sm:$0xff]  ;;  %v226_v49 = vld [vmem:[%s2690_s1 + $0x5b0] sm:$0xff]  ;;  %v176_v50 = vld [vmem:[%s2690_s1 + $0x420] sm:$0xff] }
  0x3d   :  { %661 = vmatpush.msrb.mxu2 %v142_v52  ;;  %680 = vmatpush.msrb.mxu3 %v159_v53  ;;  %v193_v51 = vld [vmem:[%s2690_s1 + $0x4a8] sm:$0xff]  ;;  %v208_v52 = vld [vmem:[%s2690_s1 + $0x520] sm:$0xff] }
  0x3e   :  { %622 = vmatpush.msrb.mxu0 %v109_v54  ;;  %641 = vmatpush.msrb.mxu1 %v126_v55  ;;  %v225_v53 = vld [vmem:[%s2690_s1 + $0x5a8] sm:$0xff]  ;;  %v175_v54 = vld [vmem:[%s2690_s1 + $0x418] sm:$0xff]  ;;  %v192_v55 = vld [vmem:[%s2690_s1 + $0x4a0] sm:$0xff] }
  0x3f   :  { %662 = vmatpush.msrb.mxu2 %v141_v56  ;;  %681 = vmatpush.msrb.mxu3 %v158_v57  ;;  %v207_v56 = vld [vmem:[%s2690_s1 + $0x518] sm:$0xff]  ;;  %v224_v57 = vld [vmem:[%s2690_s1 + $0x5a0] sm:$0xff] }
  0x40   :  { %584 = vmatmul.f32.vlgmr.msra.gmra.mxu2 %v16_v58  ;;  %623 = vmatpush.msrb.mxu0 %v108_v59  ;;  %v174_v58 = vld [vmem:[%s2690_s1 + $0x410] sm:$0xff]  ;;  %v191_v59 = vld [vmem:[%s2690_s1 + $0x498] sm:$0xff] }
  0x41   :  { %642 = vmatpush.msrb.mxu1 %v125_v60  ;;  %663 = vmatpush.msrb.mxu2 %v140_v61  ;;  %v206_v60 = vld [vmem:[%s2690_s1 + $0x510] sm:$0xff]  ;;  %v223_v61 = vld [vmem:[%s2690_s1 + $0x598] sm:$0xff] }
  0x42   :  { %682 = vmatpush.msrb.mxu3 %v157_v62  ;;  %544 = vmatmul.f32.vlgmr.msra.gmra.mxu0 %v14_v63  ;;  %v173_v62 = vld [vmem:[%s2690_s1 + $0x408] sm:$0xff]  ;;  %v190_v63 = vld [vmem:[%s2690_s1 + $0x490] sm:$0xff] }
  0x43   :  { %604 = vmatmul.f32.vlgmr.msra.gmra.mxu3 %v17_v0  ;;  %688 = vmatpush.msra.mxu0 %v187_v1  ;;  %v205_v0 = vld [vmem:[%s2690_s1 + $0x508] sm:$0xff]  ;;  %v222_v1 = vld [vmem:[%s2690_s1 + $0x590] sm:$0xff] }
  0x44   :  { %728 = vmatpush.msra.mxu2 %v219_v2  ;;  %643 = vmatpush.msrb.mxu1 %v124_v3  ;;  %v172_v2 = vld [vmem:[%s2690_s1 + $0x400] sm:$0xff]  ;;  %v189_v3 = vld [vmem:[%s2690_s1 + $0x488] sm:$0xff] }
  0x45   :  { %683 = vmatpush.msrb.mxu3 %v156_v4  ;;  %564 = vmatmul.f32.vlgmr.msra.gmra.mxu1 %v15_v5  ;;  %v204_v4 = vld [vmem:[%s2690_s1 + $0x500] sm:$0xff]  ;;  %v221_v5 = vld [vmem:[%s2690_s1 + $0x588] sm:$0xff] }
  0x46   :  { %689 = vmatpush.msra.mxu0 %v186_v6  ;;  %708 = vmatpush.msra.mxu1 %v203_v7  ;;  %v22_v6 = vld [vmem:[%s2691_s0 + $0x40] sm:$0xff]  ;;  %v24_v7 = vld [vmem:[%s2691_s0 + $0x50] sm:$0xff] }
  0x47   :  { %729 = vmatpush.msra.mxu2 %v218_v8  ;;  %748 = vmatpush.msra.mxu3 %v235_v9  ;;  %v251_v8 = vld [vmem:[%s2690_s1 + $0x678] sm:$0xff] }
  0x48   :  { %690 = vmatpush.msra.mxu0 %v185_v10  ;;  %709 = vmatpush.msra.mxu1 %v202_v11  ;;  %v283_v9 = vld [vmem:[%s2690_s1 + $0x778] sm:$0xff]  ;;  %v188_v10 = vld [vmem:[%s2690_s1 + $0x480] sm:$0xff] }
  0x49   :  { %730 = vmatpush.msra.mxu2 %v217_v12  ;;  %749 = vmatpush.msra.mxu3 %v234_v13  ;;  %v220_v11 = vld [vmem:[%s2690_s1 + $0x580] sm:$0xff]  ;;  %v23_v12 = vld [vmem:[%s2691_s0 + $0x48] sm:$0xff]  ;;  %v25_v13 = vld [vmem:[%s2691_s0 + $0x58] sm:$0xff] }
  0x4a   :  { %664 = vmatmul.f32.vlgmr.msrb.gmra.mxu2 %v20_v14  ;;  %691 = vmatpush.msra.mxu0 %v184_v15  ;;  %v250_v14 = vld [vmem:[%s2690_s1 + $0x670] sm:$0xff]  ;;  %v267_v15 = vld [vmem:[%s2690_s1 + $0x6f8] sm:$0xff] }
  0x4b   :  { %710 = vmatpush.msra.mxu1 %v201_v16  ;;  %731 = vmatpush.msra.mxu2 %v216_v17  ;;  %v282_v16 = vld [vmem:[%s2690_s1 + $0x770] sm:$0xff]  ;;  %v299_v17 = vld [vmem:[%s2690_s1 + $0x7f8] sm:$0xff] }
  0x4c   :  { %750 = vmatpush.msra.mxu3 %v233_v18  ;;  %624 = vmatmul.f32.vlgmr.msrb.gmra.mxu0 %v18_v19  ;;  %v249_v18 = vld [vmem:[%s2690_s1 + $0x668] sm:$0xff]  ;;  %v266_v19 = vld [vmem:[%s2690_s1 + $0x6f0] sm:$0xff] }
  0x4d   :  { %684 = vmatmul.f32.vlgmr.msrb.gmra.mxu3 %v21_v20  ;;  %692 = vmatpush.msra.mxu0 %v183_v21  ;;  %v281_v20 = vld [vmem:[%s2690_s1 + $0x768] sm:$0xff]  ;;  %v298_v21 = vld [vmem:[%s2690_s1 + $0x7f0] sm:$0xff] }
  0x4e   :  { %711 = vmatpush.msra.mxu1 %v200_v22  ;;  %732 = vmatpush.msra.mxu2 %v215_v23  ;;  %v248_v22 = vld [vmem:[%s2690_s1 + $0x660] sm:$0xff]  ;;  %v265_v23 = vld [vmem:[%s2690_s1 + $0x6e8] sm:$0xff] }
  0x4f   :  { %751 = vmatpush.msra.mxu3 %v232_v24  ;;  %644 = vmatmul.f32.vlgmr.msrb.gmra.mxu1 %v19_v25  ;;  %v280_v24 = vld [vmem:[%s2690_s1 + $0x760] sm:$0xff]  ;;  %v297_v25 = vld [vmem:[%s2690_s1 + $0x7e8] sm:$0xff] }
  0x50   :  { %693 = vmatpush.msra.mxu0 %v182_v26  ;;  %712 = vmatpush.msra.mxu1 %v199_v27  ;;  %v247_v26 = vld [vmem:[%s2690_s1 + $0x658] sm:$0xff]  ;;  %v264_v27 = vld [vmem:[%s2690_s1 + $0x6e0] sm:$0xff] }
  0x51   :  { %733 = vmatpush.msra.mxu2 %v214_v28  ;;  %752 = vmatpush.msra.mxu3 %v231_v29  ;;  %v279_v28 = vld [vmem:[%s2690_s1 + $0x758] sm:$0xff]  ;;  %v296_v29 = vld [vmem:[%s2690_s1 + $0x7e0] sm:$0xff] }
  0x52   :  { %694 = vmatpush.msra.mxu0 %v181_v30  ;;  %713 = vmatpush.msra.mxu1 %v198_v31  ;;  %v246_v30 = vld [vmem:[%s2690_s1 + $0x650] sm:$0xff]  ;;  %v263_v31 = vld [vmem:[%s2690_s1 + $0x6d8] sm:$0xff] }
  0x53   :  { %734 = vmatpush.msra.mxu2 %v213_v32  ;;  %753 = vmatpush.msra.mxu3 %v230_v33  ;;  %v278_v32 = vld [vmem:[%s2690_s1 + $0x750] sm:$0xff]  ;;  %v295_v33 = vld [vmem:[%s2690_s1 + $0x7d8] sm:$0xff] }
  0x54   :  { %695 = vmatpush.msra.mxu0 %v180_v34  ;;  %714 = vmatpush.msra.mxu1 %v197_v35  ;;  %v245_v34 = vld [vmem:[%s2690_s1 + $0x648] sm:$0xff]  ;;  %v262_v35 = vld [vmem:[%s2690_s1 + $0x6d0] sm:$0xff] }
  0x55   :  { %735 = vmatpush.msra.mxu2 %v212_v36  ;;  %754 = vmatpush.msra.mxu3 %v229_v37  ;;  %v277_v36 = vld [vmem:[%s2690_s1 + $0x748] sm:$0xff]  ;;  %v294_v37 = vld [vmem:[%s2690_s1 + $0x7d0] sm:$0xff] }
  0x56   :  { %696 = vmatpush.msra.mxu0 %v179_v38  ;;  %715 = vmatpush.msra.mxu1 %v196_v39  ;;  %v244_v38 = vld [vmem:[%s2690_s1 + $0x640] sm:$0xff]  ;;  %v261_v39 = vld [vmem:[%s2690_s1 + $0x6c8] sm:$0xff] }
  0x57   :  { %736 = vmatpush.msra.mxu2 %v211_v40  ;;  %755 = vmatpush.msra.mxu3 %v228_v41  ;;  %v276_v40 = vld [vmem:[%s2690_s1 + $0x740] sm:$0xff]  ;;  %v293_v41 = vld [vmem:[%s2690_s1 + $0x7c8] sm:$0xff] }
  0x58   :  { %697 = vmatpush.msra.mxu0 %v178_v42  ;;  %716 = vmatpush.msra.mxu1 %v195_v43  ;;  %v243_v42 = vld [vmem:[%s2690_s1 + $0x638] sm:$0xff]  ;;  %v260_v43 = vld [vmem:[%s2690_s1 + $0x6c0] sm:$0xff] }
  0x59   :  { %737 = vmatpush.msra.mxu2 %v210_v44  ;;  %756 = vmatpush.msra.mxu3 %v227_v45  ;;  %v275_v44 = vld [vmem:[%s2690_s1 + $0x738] sm:$0xff]  ;;  %v292_v45 = vld [vmem:[%s2690_s1 + $0x7c0] sm:$0xff] }
  0x5a   :  { %698 = vmatpush.msra.mxu0 %v177_v46  ;;  %717 = vmatpush.msra.mxu1 %v194_v47  ;;  %v242_v46 = vld [vmem:[%s2690_s1 + $0x630] sm:$0xff]  ;;  %v259_v47 = vld [vmem:[%s2690_s1 + $0x6b8] sm:$0xff] }
  0x5b   :  { %738 = vmatpush.msra.mxu2 %v209_v48  ;;  %757 = vmatpush.msra.mxu3 %v226_v49  ;;  %v274_v48 = vld [vmem:[%s2690_s1 + $0x730] sm:$0xff]  ;;  %v291_v49 = vld [vmem:[%s2690_s1 + $0x7b8] sm:$0xff] }
  0x5c   :  { %699 = vmatpush.msra.mxu0 %v176_v50  ;;  %718 = vmatpush.msra.mxu1 %v193_v51  ;;  %v241_v50 = vld [vmem:[%s2690_s1 + $0x628] sm:$0xff]  ;;  %v258_v51 = vld [vmem:[%s2690_s1 + $0x6b0] sm:$0xff] }
  0x5d   :  { %739 = vmatpush.msra.mxu2 %v208_v52  ;;  %758 = vmatpush.msra.mxu3 %v225_v53  ;;  %v273_v52 = vld [vmem:[%s2690_s1 + $0x728] sm:$0xff]  ;;  %v290_v53 = vld [vmem:[%s2690_s1 + $0x7b0] sm:$0xff] }
  0x5e   :  { %700 = vmatpush.msra.mxu0 %v175_v54  ;;  %719 = vmatpush.msra.mxu1 %v192_v55  ;;  %v240_v54 = vld [vmem:[%s2690_s1 + $0x620] sm:$0xff]  ;;  %v257_v55 = vld [vmem:[%s2690_s1 + $0x6a8] sm:$0xff] }
  0x5f   :  { %740 = vmatpush.msra.mxu2 %v207_v56  ;;  %759 = vmatpush.msra.mxu3 %v224_v57  ;;  %v272_v56 = vld [vmem:[%s2690_s1 + $0x720] sm:$0xff]  ;;  %v289_v57 = vld [vmem:[%s2690_s1 + $0x7a8] sm:$0xff] }
  0x60   :  { %701 = vmatpush.msra.mxu0 %v174_v58  ;;  %720 = vmatpush.msra.mxu1 %v191_v59  ;;  %v239_v58 = vld [vmem:[%s2690_s1 + $0x618] sm:$0xff]  ;;  %v256_v59 = vld [vmem:[%s2690_s1 + $0x6a0] sm:$0xff] }
  0x61   :  { %741 = vmatpush.msra.mxu2 %v206_v60  ;;  %760 = vmatpush.msra.mxu3 %v223_v61  ;;  %v271_v60 = vld [vmem:[%s2690_s1 + $0x718] sm:$0xff]  ;;  %v288_v61 = vld [vmem:[%s2690_s1 + $0x7a0] sm:$0xff] }
  0x62   :  { %702 = vmatpush.msra.mxu0 %v173_v62  ;;  %721 = vmatpush.msra.mxu1 %v190_v63  ;;  %v238_v62 = vld [vmem:[%s2690_s1 + $0x610] sm:$0xff]  ;;  %v255_v63 = vld [vmem:[%s2690_s1 + $0x698] sm:$0xff] }
  0x63   :  { %742 = vmatpush.msra.mxu2 %v205_v0  ;;  %761 = vmatpush.msra.mxu3 %v222_v1  ;;  %v270_v0 = vld [vmem:[%s2690_s1 + $0x710] sm:$0xff]  ;;  %v287_v1 = vld [vmem:[%s2690_s1 + $0x798] sm:$0xff] }
  0x64   :  { %703 = vmatpush.msra.mxu0 %v172_v2  ;;  %722 = vmatpush.msra.mxu1 %v189_v3  ;;  %v237_v2 = vld [vmem:[%s2690_s1 + $0x608] sm:$0xff]  ;;  %v254_v3 = vld [vmem:[%s2690_s1 + $0x690] sm:$0xff] }
  0x65   :  { %743 = vmatpush.msra.mxu2 %v204_v4  ;;  %762 = vmatpush.msra.mxu3 %v221_v5  ;;  %v269_v4 = vld [vmem:[%s2690_s1 + $0x708] sm:$0xff]  ;;  %v286_v5 = vld [vmem:[%s2690_s1 + $0x790] sm:$0xff] }
  0x66   :  { %704 = vmatmul.f32.vlgmr.msra.gmra.mxu0 %v22_v6  ;;  %744 = vmatmul.f32.vlgmr.msra.gmra.mxu2 %v24_v7  ;;  %v236_v6 = vld [vmem:[%s2690_s1 + $0x600] sm:$0xff]  ;;  %v253_v7 = vld [vmem:[%s2690_s1 + $0x688] sm:$0xff] }
  0x67   :  { %768 = vmatpush.msrb.mxu0 %v251_v8  ;;  %808 = vmatpush.msrb.mxu2 %v283_v9  ;;  %v268_v8 = vld [vmem:[%s2690_s1 + $0x700] sm:$0xff]  ;;  %v285_v9 = vld [vmem:[%s2690_s1 + $0x788] sm:$0xff] }
  0x68   :  { %723 = vmatpush.msra.mxu1 %v188_v10  ;;  %763 = vmatpush.msra.mxu3 %v220_v11  ;;  %v26_v10 = vld [vmem:[%s2691_s0 + $0x60] sm:$0xff]  ;;  %v28_v11 = vld [vmem:[%s2691_s0 + $0x70] sm:$0xff] }
  0x69   :  { %724 = vmatmul.f32.vlgmr.msra.gmra.mxu1 %v23_v12  ;;  %764 = vmatmul.f32.vlgmr.msra.gmra.mxu3 %v25_v13  ;;  %v315_v12 = vld [vmem:[%s2690_s1 + $0x878] sm:$0xff] }
  0x6a   :  { %769 = vmatpush.msrb.mxu0 %v250_v14  ;;  %788 = vmatpush.msrb.mxu1 %v267_v15  ;;  %v347_v13 = vld [vmem:[%s2690_s1 + $0x978] sm:$0xff]  ;;  %v252_v14 = vld [vmem:[%s2690_s1 + $0x680] sm:$0xff] }
  0x6b   :  { %809 = vmatpush.msrb.mxu2 %v282_v16  ;;  %828 = vmatpush.msrb.mxu3 %v299_v17  ;;  %v284_v15 = vld [vmem:[%s2690_s1 + $0x780] sm:$0xff]  ;;  %v27_v16 = vld [vmem:[%s2691_s0 + $0x68] sm:$0xff]  ;;  %v29_v17 = vld [vmem:[%s2691_s0 + $0x78] sm:$0xff] }
  0x6c   :  { %770 = vmatpush.msrb.mxu0 %v249_v18  ;;  %789 = vmatpush.msrb.mxu1 %v266_v19  ;;  %v314_v18 = vld [vmem:[%s2690_s1 + $0x870] sm:$0xff]  ;;  %v331_v19 = vld [vmem:[%s2690_s1 + $0x8f8] sm:$0xff] }
  0x6d   :  { %810 = vmatpush.msrb.mxu2 %v281_v20  ;;  %829 = vmatpush.msrb.mxu3 %v298_v21  ;;  %v346_v20 = vld [vmem:[%s2690_s1 + $0x970] sm:$0xff]  ;;  %v363_v21 = vld [vmem:[%s2690_s1 + $0x9f8] sm:$0xff] }
  0x6e   :  { %771 = vmatpush.msrb.mxu0 %v248_v22  ;;  %790 = vmatpush.msrb.mxu1 %v265_v23  ;;  %v313_v22 = vld [vmem:[%s2690_s1 + $0x868] sm:$0xff]  ;;  %v330_v23 = vld [vmem:[%s2690_s1 + $0x8f0] sm:$0xff] }
  0x6f   :  { %811 = vmatpush.msrb.mxu2 %v280_v24  ;;  %830 = vmatpush.msrb.mxu3 %v297_v25  ;;  %v345_v24 = vld [vmem:[%s2690_s1 + $0x968] sm:$0xff]  ;;  %v362_v25 = vld [vmem:[%s2690_s1 + $0x9f0] sm:$0xff] }
  0x70   :  { %772 = vmatpush.msrb.mxu0 %v247_v26  ;;  %791 = vmatpush.msrb.mxu1 %v264_v27  ;;  %v312_v26 = vld [vmem:[%s2690_s1 + $0x860] sm:$0xff]  ;;  %v329_v27 = vld [vmem:[%s2690_s1 + $0x8e8] sm:$0xff] }
  0x71   :  { %812 = vmatpush.msrb.mxu2 %v279_v28  ;;  %831 = vmatpush.msrb.mxu3 %v296_v29  ;;  %v344_v28 = vld [vmem:[%s2690_s1 + $0x960] sm:$0xff]  ;;  %v361_v29 = vld [vmem:[%s2690_s1 + $0x9e8] sm:$0xff] }
  0x72   :  { %773 = vmatpush.msrb.mxu0 %v246_v30  ;;  %792 = vmatpush.msrb.mxu1 %v263_v31  ;;  %v311_v30 = vld [vmem:[%s2690_s1 + $0x858] sm:$0xff]  ;;  %v328_v31 = vld [vmem:[%s2690_s1 + $0x8e0] sm:$0xff] }
  0x73   :  { %813 = vmatpush.msrb.mxu2 %v278_v32  ;;  %832 = vmatpush.msrb.mxu3 %v295_v33  ;;  %v343_v32 = vld [vmem:[%s2690_s1 + $0x958] sm:$0xff]  ;;  %v360_v33 = vld [vmem:[%s2690_s1 + $0x9e0] sm:$0xff] }
  0x74   :  { %774 = vmatpush.msrb.mxu0 %v245_v34  ;;  %793 = vmatpush.msrb.mxu1 %v262_v35  ;;  %v310_v34 = vld [vmem:[%s2690_s1 + $0x850] sm:$0xff]  ;;  %v327_v35 = vld [vmem:[%s2690_s1 + $0x8d8] sm:$0xff] }
  0x75   :  { %814 = vmatpush.msrb.mxu2 %v277_v36  ;;  %833 = vmatpush.msrb.mxu3 %v294_v37  ;;  %v342_v36 = vld [vmem:[%s2690_s1 + $0x950] sm:$0xff]  ;;  %v359_v37 = vld [vmem:[%s2690_s1 + $0x9d8] sm:$0xff] }
  0x76   :  { %775 = vmatpush.msrb.mxu0 %v244_v38  ;;  %794 = vmatpush.msrb.mxu1 %v261_v39  ;;  %v309_v38 = vld [vmem:[%s2690_s1 + $0x848] sm:$0xff]  ;;  %v326_v39 = vld [vmem:[%s2690_s1 + $0x8d0] sm:$0xff] }
  0x77   :  { %815 = vmatpush.msrb.mxu2 %v276_v40  ;;  %834 = vmatpush.msrb.mxu3 %v293_v41  ;;  %v341_v40 = vld [vmem:[%s2690_s1 + $0x948] sm:$0xff]  ;;  %v358_v41 = vld [vmem:[%s2690_s1 + $0x9d0] sm:$0xff] }
  0x78   :  { %776 = vmatpush.msrb.mxu0 %v243_v42  ;;  %795 = vmatpush.msrb.mxu1 %v260_v43  ;;  %v308_v42 = vld [vmem:[%s2690_s1 + $0x840] sm:$0xff]  ;;  %v325_v43 = vld [vmem:[%s2690_s1 + $0x8c8] sm:$0xff] }
  0x79   :  { %816 = vmatpush.msrb.mxu2 %v275_v44  ;;  %835 = vmatpush.msrb.mxu3 %v292_v45  ;;  %v340_v44 = vld [vmem:[%s2690_s1 + $0x940] sm:$0xff]  ;;  %v357_v45 = vld [vmem:[%s2690_s1 + $0x9c8] sm:$0xff] }
  0x7a   :  { %777 = vmatpush.msrb.mxu0 %v242_v46  ;;  %796 = vmatpush.msrb.mxu1 %v259_v47  ;;  %v307_v46 = vld [vmem:[%s2690_s1 + $0x838] sm:$0xff]  ;;  %v324_v47 = vld [vmem:[%s2690_s1 + $0x8c0] sm:$0xff] }
  0x7b   :  { %817 = vmatpush.msrb.mxu2 %v274_v48  ;;  %836 = vmatpush.msrb.mxu3 %v291_v49  ;;  %v339_v48 = vld [vmem:[%s2690_s1 + $0x938] sm:$0xff]  ;;  %v356_v49 = vld [vmem:[%s2690_s1 + $0x9c0] sm:$0xff] }
  0x7c   :  { %778 = vmatpush.msrb.mxu0 %v241_v50  ;;  %797 = vmatpush.msrb.mxu1 %v258_v51  ;;  %v306_v50 = vld [vmem:[%s2690_s1 + $0x830] sm:$0xff]  ;;  %v323_v51 = vld [vmem:[%s2690_s1 + $0x8b8] sm:$0xff] }
  0x7d   :  { %818 = vmatpush.msrb.mxu2 %v273_v52  ;;  %837 = vmatpush.msrb.mxu3 %v290_v53  ;;  %v338_v52 = vld [vmem:[%s2690_s1 + $0x930] sm:$0xff]  ;;  %v355_v53 = vld [vmem:[%s2690_s1 + $0x9b8] sm:$0xff] }
  0x7e   :  { %779 = vmatpush.msrb.mxu0 %v240_v54  ;;  %798 = vmatpush.msrb.mxu1 %v257_v55  ;;  %v305_v54 = vld [vmem:[%s2690_s1 + $0x828] sm:$0xff]  ;;  %v322_v55 = vld [vmem:[%s2690_s1 + $0x8b0] sm:$0xff] }
  0x7f   :  { %819 = vmatpush.msrb.mxu2 %v272_v56  ;;  %838 = vmatpush.msrb.mxu3 %v289_v57  ;;  %v337_v56 = vld [vmem:[%s2690_s1 + $0x928] sm:$0xff]  ;;  %v354_v57 = vld [vmem:[%s2690_s1 + $0x9b0] sm:$0xff] }
  0x80   :  { %780 = vmatpush.msrb.mxu0 %v239_v58  ;;  %799 = vmatpush.msrb.mxu1 %v256_v59  ;;  %v304_v58 = vld [vmem:[%s2690_s1 + $0x820] sm:$0xff]  ;;  %v321_v59 = vld [vmem:[%s2690_s1 + $0x8a8] sm:$0xff] }
  0x81   :  { %820 = vmatpush.msrb.mxu2 %v271_v60  ;;  %839 = vmatpush.msrb.mxu3 %v288_v61  ;;  %v336_v60 = vld [vmem:[%s2690_s1 + $0x920] sm:$0xff]  ;;  %v353_v61 = vld [vmem:[%s2690_s1 + $0x9a8] sm:$0xff] }
  0x82   :  { %781 = vmatpush.msrb.mxu0 %v238_v62  ;;  %800 = vmatpush.msrb.mxu1 %v255_v63  ;;  %v303_v62 = vld [vmem:[%s2690_s1 + $0x818] sm:$0xff]  ;;  %v320_v63 = vld [vmem:[%s2690_s1 + $0x8a0] sm:$0xff] }
  0x83   :  { %821 = vmatpush.msrb.mxu2 %v270_v0  ;;  %840 = vmatpush.msrb.mxu3 %v287_v1  ;;  %v335_v0 = vld [vmem:[%s2690_s1 + $0x918] sm:$0xff]  ;;  %v352_v1 = vld [vmem:[%s2690_s1 + $0x9a0] sm:$0xff] }
  0x84   :  { %782 = vmatpush.msrb.mxu0 %v237_v2  ;;  %801 = vmatpush.msrb.mxu1 %v254_v3  ;;  %v302_v2 = vld [vmem:[%s2690_s1 + $0x810] sm:$0xff]  ;;  %v319_v3 = vld [vmem:[%s2690_s1 + $0x898] sm:$0xff] }
  0x85   :  { %822 = vmatpush.msrb.mxu2 %v269_v4  ;;  %841 = vmatpush.msrb.mxu3 %v286_v5  ;;  %v334_v4 = vld [vmem:[%s2690_s1 + $0x910] sm:$0xff]  ;;  %v351_v5 = vld [vmem:[%s2690_s1 + $0x998] sm:$0xff] }
  0x86   :  { %783 = vmatpush.msrb.mxu0 %v236_v6  ;;  %802 = vmatpush.msrb.mxu1 %v253_v7  ;;  %v301_v6 = vld [vmem:[%s2690_s1 + $0x808] sm:$0xff]  ;;  %v318_v7 = vld [vmem:[%s2690_s1 + $0x890] sm:$0xff] }
  0x87   :  { %823 = vmatpush.msrb.mxu2 %v268_v8  ;;  %842 = vmatpush.msrb.mxu3 %v285_v9  ;;  %v333_v8 = vld [vmem:[%s2690_s1 + $0x908] sm:$0xff]  ;;  %v350_v9 = vld [vmem:[%s2690_s1 + $0x990] sm:$0xff] }
  0x88   :  { %784 = vmatmul.f32.vlgmr.msrb.gmra.mxu0 %v26_v10  ;;  %824 = vmatmul.f32.vlgmr.msrb.gmra.mxu2 %v28_v11  ;;  %v300_v10 = vld [vmem:[%s2690_s1 + $0x800] sm:$0xff]  ;;  %v317_v11 = vld [vmem:[%s2690_s1 + $0x888] sm:$0xff] }
  0x89   :  { %848 = vmatpush.msra.mxu0 %v315_v12  ;;  %888 = vmatpush.msra.mxu2 %v347_v13  ;;  %v332_v12 = vld [vmem:[%s2690_s1 + $0x900] sm:$0xff]  ;;  %v349_v13 = vld [vmem:[%s2690_s1 + $0x988] sm:$0xff] }
  0x8a   :  { %803 = vmatpush.msrb.mxu1 %v252_v14  ;;  %843 = vmatpush.msrb.mxu3 %v284_v15  ;;  %v30_v14 = vld [vmem:[%s2691_s0 + $0x80] sm:$0xff]  ;;  %v32_v15 = vld [vmem:[%s2691_s0 + $0x90] sm:$0xff] }
  0x8b   :  { %804 = vmatmul.f32.vlgmr.msrb.gmra.mxu1 %v27_v16  ;;  %844 = vmatmul.f32.vlgmr.msrb.gmra.mxu3 %v29_v17  ;;  %v379_v16 = vld [vmem:[%s2690_s1 + $0xa78] sm:$0xff] }
  0x8c   :  { %849 = vmatpush.msra.mxu0 %v314_v18  ;;  %868 = vmatpush.msra.mxu1 %v331_v19  ;;  %v411_v17 = vld [vmem:[%s2690_s1 + $0xb78] sm:$0xff]  ;;  %v316_v18 = vld [vmem:[%s2690_s1 + $0x880] sm:$0xff] }
  0x8d   :  { %889 = vmatpush.msra.mxu2 %v346_v20  ;;  %908 = vmatpush.msra.mxu3 %v363_v21  ;;  %v348_v19 = vld [vmem:[%s2690_s1 + $0x980] sm:$0xff]  ;;  %v31_v20 = vld [vmem:[%s2691_s0 + $0x88] sm:$0xff]  ;;  %v33_v21 = vld [vmem:[%s2691_s0 + $0x98] sm:$0xff] }
  0x8e   :  { %850 = vmatpush.msra.mxu0 %v313_v22  ;;  %869 = vmatpush.msra.mxu1 %v330_v23  ;;  %v378_v22 = vld [vmem:[%s2690_s1 + $0xa70] sm:$0xff]  ;;  %v395_v23 = vld [vmem:[%s2690_s1 + $0xaf8] sm:$0xff] }
  0x8f   :  { %890 = vmatpush.msra.mxu2 %v345_v24  ;;  %909 = vmatpush.msra.mxu3 %v362_v25  ;;  %v410_v24 = vld [vmem:[%s2690_s1 + $0xb70] sm:$0xff]  ;;  %v427_v25 = vld [vmem:[%s2690_s1 + $0xbf8] sm:$0xff] }
  0x90   :  { %851 = vmatpush.msra.mxu0 %v312_v26  ;;  %870 = vmatpush.msra.mxu1 %v329_v27  ;;  %v377_v26 = vld [vmem:[%s2690_s1 + $0xa68] sm:$0xff]  ;;  %v394_v27 = vld [vmem:[%s2690_s1 + $0xaf0] sm:$0xff] }
  0x91   :  { %891 = vmatpush.msra.mxu2 %v344_v28  ;;  %910 = vmatpush.msra.mxu3 %v361_v29  ;;  %v409_v28 = vld [vmem:[%s2690_s1 + $0xb68] sm:$0xff]  ;;  %v426_v29 = vld [vmem:[%s2690_s1 + $0xbf0] sm:$0xff] }
  0x92   :  { %852 = vmatpush.msra.mxu0 %v311_v30  ;;  %871 = vmatpush.msra.mxu1 %v328_v31  ;;  %v376_v30 = vld [vmem:[%s2690_s1 + $0xa60] sm:$0xff]  ;;  %v393_v31 = vld [vmem:[%s2690_s1 + $0xae8] sm:$0xff] }
  0x93   :  { %892 = vmatpush.msra.mxu2 %v343_v32  ;;  %911 = vmatpush.msra.mxu3 %v360_v33  ;;  %v408_v32 = vld [vmem:[%s2690_s1 + $0xb60] sm:$0xff]  ;;  %v425_v33 = vld [vmem:[%s2690_s1 + $0xbe8] sm:$0xff] }
  0x94   :  { %853 = vmatpush.msra.mxu0 %v310_v34  ;;  %872 = vmatpush.msra.mxu1 %v327_v35  ;;  %v375_v34 = vld [vmem:[%s2690_s1 + $0xa58] sm:$0xff]  ;;  %v392_v35 = vld [vmem:[%s2690_s1 + $0xae0] sm:$0xff] }
  0x95   :  { %893 = vmatpush.msra.mxu2 %v342_v36  ;;  %912 = vmatpush.msra.mxu3 %v359_v37  ;;  %v407_v36 = vld [vmem:[%s2690_s1 + $0xb58] sm:$0xff]  ;;  %v424_v37 = vld [vmem:[%s2690_s1 + $0xbe0] sm:$0xff] }
  0x96   :  { %854 = vmatpush.msra.mxu0 %v309_v38  ;;  %873 = vmatpush.msra.mxu1 %v326_v39  ;;  %v374_v38 = vld [vmem:[%s2690_s1 + $0xa50] sm:$0xff]  ;;  %v391_v39 = vld [vmem:[%s2690_s1 + $0xad8] sm:$0xff] }
  0x97   :  { %894 = vmatpush.msra.mxu2 %v341_v40  ;;  %913 = vmatpush.msra.mxu3 %v358_v41  ;;  %v406_v40 = vld [vmem:[%s2690_s1 + $0xb50] sm:$0xff]  ;;  %v423_v41 = vld [vmem:[%s2690_s1 + $0xbd8] sm:$0xff] }
  0x98   :  { %855 = vmatpush.msra.mxu0 %v308_v42  ;;  %874 = vmatpush.msra.mxu1 %v325_v43  ;;  %v373_v42 = vld [vmem:[%s2690_s1 + $0xa48] sm:$0xff]  ;;  %v390_v43 = vld [vmem:[%s2690_s1 + $0xad0] sm:$0xff] }
  0x99   :  { %895 = vmatpush.msra.mxu2 %v340_v44  ;;  %914 = vmatpush.msra.mxu3 %v357_v45  ;;  %v405_v44 = vld [vmem:[%s2690_s1 + $0xb48] sm:$0xff]  ;;  %v422_v45 = vld [vmem:[%s2690_s1 + $0xbd0] sm:$0xff] }
  0x9a   :  { %856 = vmatpush.msra.mxu0 %v307_v46  ;;  %875 = vmatpush.msra.mxu1 %v324_v47  ;;  %v372_v46 = vld [vmem:[%s2690_s1 + $0xa40] sm:$0xff]  ;;  %v389_v47 = vld [vmem:[%s2690_s1 + $0xac8] sm:$0xff] }
  0x9b   :  { %896 = vmatpush.msra.mxu2 %v339_v48  ;;  %915 = vmatpush.msra.mxu3 %v356_v49  ;;  %v404_v48 = vld [vmem:[%s2690_s1 + $0xb40] sm:$0xff]  ;;  %v421_v49 = vld [vmem:[%s2690_s1 + $0xbc8] sm:$0xff] }
  0x9c   :  { %857 = vmatpush.msra.mxu0 %v306_v50  ;;  %876 = vmatpush.msra.mxu1 %v323_v51  ;;  %v371_v50 = vld [vmem:[%s2690_s1 + $0xa38] sm:$0xff]  ;;  %v388_v51 = vld [vmem:[%s2690_s1 + $0xac0] sm:$0xff] }
  0x9d   :  { %897 = vmatpush.msra.mxu2 %v338_v52  ;;  %916 = vmatpush.msra.mxu3 %v355_v53  ;;  %v403_v52 = vld [vmem:[%s2690_s1 + $0xb38] sm:$0xff]  ;;  %v420_v53 = vld [vmem:[%s2690_s1 + $0xbc0] sm:$0xff] }
  0x9e   :  { %858 = vmatpush.msra.mxu0 %v305_v54  ;;  %877 = vmatpush.msra.mxu1 %v322_v55  ;;  %v370_v54 = vld [vmem:[%s2690_s1 + $0xa30] sm:$0xff]  ;;  %v387_v55 = vld [vmem:[%s2690_s1 + $0xab8] sm:$0xff] }
  0x9f   :  { %898 = vmatpush.msra.mxu2 %v337_v56  ;;  %917 = vmatpush.msra.mxu3 %v354_v57  ;;  %v402_v56 = vld [vmem:[%s2690_s1 + $0xb30] sm:$0xff]  ;;  %v419_v57 = vld [vmem:[%s2690_s1 + $0xbb8] sm:$0xff] }
  0xa0   :  { %859 = vmatpush.msra.mxu0 %v304_v58  ;;  %878 = vmatpush.msra.mxu1 %v321_v59  ;;  %v369_v58 = vld [vmem:[%s2690_s1 + $0xa28] sm:$0xff]  ;;  %v386_v59 = vld [vmem:[%s2690_s1 + $0xab0] sm:$0xff] }
  0xa1   :  { %899 = vmatpush.msra.mxu2 %v336_v60  ;;  %918 = vmatpush.msra.mxu3 %v353_v61  ;;  %v401_v60 = vld [vmem:[%s2690_s1 + $0xb28] sm:$0xff]  ;;  %v418_v61 = vld [vmem:[%s2690_s1 + $0xbb0] sm:$0xff] }
  0xa2   :  { %860 = vmatpush.msra.mxu0 %v303_v62  ;;  %879 = vmatpush.msra.mxu1 %v320_v63  ;;  %v368_v62 = vld [vmem:[%s2690_s1 + $0xa20] sm:$0xff]  ;;  %v385_v63 = vld [vmem:[%s2690_s1 + $0xaa8] sm:$0xff] }
  0xa3   :  { %900 = vmatpush.msra.mxu2 %v335_v0  ;;  %919 = vmatpush.msra.mxu3 %v352_v1  ;;  %v400_v0 = vld [vmem:[%s2690_s1 + $0xb20] sm:$0xff]  ;;  %v417_v1 = vld [vmem:[%s2690_s1 + $0xba8] sm:$0xff] }
  0xa4   :  { %861 = vmatpush.msra.mxu0 %v302_v2  ;;  %880 = vmatpush.msra.mxu1 %v319_v3  ;;  %v367_v2 = vld [vmem:[%s2690_s1 + $0xa18] sm:$0xff]  ;;  %v384_v3 = vld [vmem:[%s2690_s1 + $0xaa0] sm:$0xff] }
  0xa5   :  { %901 = vmatpush.msra.mxu2 %v334_v4  ;;  %920 = vmatpush.msra.mxu3 %v351_v5  ;;  %v399_v4 = vld [vmem:[%s2690_s1 + $0xb18] sm:$0xff]  ;;  %v416_v5 = vld [vmem:[%s2690_s1 + $0xba0] sm:$0xff] }
  0xa6   :  { %862 = vmatpush.msra.mxu0 %v301_v6  ;;  %881 = vmatpush.msra.mxu1 %v318_v7  ;;  %v366_v6 = vld [vmem:[%s2690_s1 + $0xa10] sm:$0xff]  ;;  %v383_v7 = vld [vmem:[%s2690_s1 + $0xa98] sm:$0xff] }
  0xa7   :  { %902 = vmatpush.msra.mxu2 %v333_v8  ;;  %921 = vmatpush.msra.mxu3 %v350_v9  ;;  %v398_v8 = vld [vmem:[%s2690_s1 + $0xb10] sm:$0xff]  ;;  %v415_v9 = vld [vmem:[%s2690_s1 + $0xb98] sm:$0xff] }
  0xa8   :  { %863 = vmatpush.msra.mxu0 %v300_v10  ;;  %882 = vmatpush.msra.mxu1 %v317_v11  ;;  %v365_v10 = vld [vmem:[%s2690_s1 + $0xa08] sm:$0xff]  ;;  %v382_v11 = vld [vmem:[%s2690_s1 + $0xa90] sm:$0xff] }
  0xa9   :  { %903 = vmatpush.msra.mxu2 %v332_v12  ;;  %922 = vmatpush.msra.mxu3 %v349_v13  ;;  %v397_v12 = vld [vmem:[%s2690_s1 + $0xb08] sm:$0xff]  ;;  %v414_v13 = vld [vmem:[%s2690_s1 + $0xb90] sm:$0xff] }
  0xaa   :  { %864 = vmatmul.f32.vlgmr.msra.gmra.mxu0 %v30_v14  ;;  %904 = vmatmul.f32.vlgmr.msra.gmra.mxu2 %v32_v15  ;;  %v364_v14 = vld [vmem:[%s2690_s1 + $0xa00] sm:$0xff]  ;;  %v381_v15 = vld [vmem:[%s2690_s1 + $0xa88] sm:$0xff] }
  0xab   :  { %928 = vmatpush.msrb.mxu0 %v379_v16  ;;  %968 = vmatpush.msrb.mxu2 %v411_v17  ;;  %v396_v16 = vld [vmem:[%s2690_s1 + $0xb00] sm:$0xff]  ;;  %v413_v17 = vld [vmem:[%s2690_s1 + $0xb88] sm:$0xff] }
  0xac   :  { %883 = vmatpush.msra.mxu1 %v316_v18  ;;  %923 = vmatpush.msra.mxu3 %v348_v19  ;;  %v34_v18 = vld [vmem:[%s2691_s0 + $0xa0] sm:$0xff]  ;;  %v36_v19 = vld [vmem:[%s2691_s0 + $0xb0] sm:$0xff] }
  0xad   :  { %884 = vmatmul.f32.vlgmr.msra.gmra.mxu1 %v31_v20  ;;  %924 = vmatmul.f32.vlgmr.msra.gmra.mxu3 %v33_v21  ;;  %v443_v20 = vld [vmem:[%s2690_s1 + $0xc78] sm:$0xff] }
  0xae   :  { %929 = vmatpush.msrb.mxu0 %v378_v22  ;;  %948 = vmatpush.msrb.mxu1 %v395_v23  ;;  %v475_v21 = vld [vmem:[%s2690_s1 + $0xd78] sm:$0xff]  ;;  %v380_v22 = vld [vmem:[%s2690_s1 + $0xa80] sm:$0xff] }
  0xaf   :  { %969 = vmatpush.msrb.mxu2 %v410_v24  ;;  %988 = vmatpush.msrb.mxu3 %v427_v25  ;;  %v412_v23 = vld [vmem:[%s2690_s1 + $0xb80] sm:$0xff]  ;;  %v35_v24 = vld [vmem:[%s2691_s0 + $0xa8] sm:$0xff]  ;;  %v37_v25 = vld [vmem:[%s2691_s0 + $0xb8] sm:$0xff] }
  0xb0   :  { %930 = vmatpush.msrb.mxu0 %v377_v26  ;;  %949 = vmatpush.msrb.mxu1 %v394_v27  ;;  %v442_v26 = vld [vmem:[%s2690_s1 + $0xc70] sm:$0xff]  ;;  %v459_v27 = vld [vmem:[%s2690_s1 + $0xcf8] sm:$0xff] }
  0xb1   :  { %970 = vmatpush.msrb.mxu2 %v409_v28  ;;  %989 = vmatpush.msrb.mxu3 %v426_v29  ;;  %v474_v28 = vld [vmem:[%s2690_s1 + $0xd70] sm:$0xff]  ;;  %v491_v29 = vld [vmem:[%s2690_s1 + $0xdf8] sm:$0xff] }
  0xb2   :  { %931 = vmatpush.msrb.mxu0 %v376_v30  ;;  %950 = vmatpush.msrb.mxu1 %v393_v31  ;;  %v441_v30 = vld [vmem:[%s2690_s1 + $0xc68] sm:$0xff]  ;;  %v458_v31 = vld [vmem:[%s2690_s1 + $0xcf0] sm:$0xff] }
  0xb3   :  { %971 = vmatpush.msrb.mxu2 %v408_v32  ;;  %990 = vmatpush.msrb.mxu3 %v425_v33  ;;  %v473_v32 = vld [vmem:[%s2690_s1 + $0xd68] sm:$0xff]  ;;  %v490_v33 = vld [vmem:[%s2690_s1 + $0xdf0] sm:$0xff] }
  0xb4   :  { %932 = vmatpush.msrb.mxu0 %v375_v34  ;;  %951 = vmatpush.msrb.mxu1 %v392_v35  ;;  %v440_v34 = vld [vmem:[%s2690_s1 + $0xc60] sm:$0xff]  ;;  %v457_v35 = vld [vmem:[%s2690_s1 + $0xce8] sm:$0xff] }
  0xb5   :  { %972 = vmatpush.msrb.mxu2 %v407_v36  ;;  %991 = vmatpush.msrb.mxu3 %v424_v37  ;;  %v472_v36 = vld [vmem:[%s2690_s1 + $0xd60] sm:$0xff]  ;;  %v489_v37 = vld [vmem:[%s2690_s1 + $0xde8] sm:$0xff] }
  0xb6   :  { %933 = vmatpush.msrb.mxu0 %v374_v38  ;;  %952 = vmatpush.msrb.mxu1 %v391_v39  ;;  %v439_v38 = vld [vmem:[%s2690_s1 + $0xc58] sm:$0xff]  ;;  %v456_v39 = vld [vmem:[%s2690_s1 + $0xce0] sm:$0xff] }
  0xb7   :  { %973 = vmatpush.msrb.mxu2 %v406_v40  ;;  %992 = vmatpush.msrb.mxu3 %v423_v41  ;;  %v471_v40 = vld [vmem:[%s2690_s1 + $0xd58] sm:$0xff]  ;;  %v488_v41 = vld [vmem:[%s2690_s1 + $0xde0] sm:$0xff] }
  0xb8   :  { %934 = vmatpush.msrb.mxu0 %v373_v42  ;;  %953 = vmatpush.msrb.mxu1 %v390_v43  ;;  %v438_v42 = vld [vmem:[%s2690_s1 + $0xc50] sm:$0xff]  ;;  %v455_v43 = vld [vmem:[%s2690_s1 + $0xcd8] sm:$0xff] }
  0xb9   :  { %974 = vmatpush.msrb.mxu2 %v405_v44  ;;  %993 = vmatpush.msrb.mxu3 %v422_v45  ;;  %v470_v44 = vld [vmem:[%s2690_s1 + $0xd50] sm:$0xff]  ;;  %v487_v45 = vld [vmem:[%s2690_s1 + $0xdd8] sm:$0xff] }
  0xba   :  { %935 = vmatpush.msrb.mxu0 %v372_v46  ;;  %954 = vmatpush.msrb.mxu1 %v389_v47  ;;  %v437_v46 = vld [vmem:[%s2690_s1 + $0xc48] sm:$0xff]  ;;  %v454_v47 = vld [vmem:[%s2690_s1 + $0xcd0] sm:$0xff] }
  0xbb   :  { %975 = vmatpush.msrb.mxu2 %v404_v48  ;;  %994 = vmatpush.msrb.mxu3 %v421_v49  ;;  %v469_v48 = vld [vmem:[%s2690_s1 + $0xd48] sm:$0xff]  ;;  %v486_v49 = vld [vmem:[%s2690_s1 + $0xdd0] sm:$0xff] }
  0xbc   :  { %936 = vmatpush.msrb.mxu0 %v371_v50  ;;  %955 = vmatpush.msrb.mxu1 %v388_v51  ;;  %v436_v50 = vld [vmem:[%s2690_s1 + $0xc40] sm:$0xff]  ;;  %v453_v51 = vld [vmem:[%s2690_s1 + $0xcc8] sm:$0xff] }
  0xbd   :  { %976 = vmatpush.msrb.mxu2 %v403_v52  ;;  %995 = vmatpush.msrb.mxu3 %v420_v53  ;;  %v468_v52 = vld [vmem:[%s2690_s1 + $0xd40] sm:$0xff]  ;;  %v485_v53 = vld [vmem:[%s2690_s1 + $0xdc8] sm:$0xff] }
  0xbe   :  { %937 = vmatpush.msrb.mxu0 %v370_v54  ;;  %956 = vmatpush.msrb.mxu1 %v387_v55  ;;  %v435_v54 = vld [vmem:[%s2690_s1 + $0xc38] sm:$0xff]  ;;  %v452_v55 = vld [vmem:[%s2690_s1 + $0xcc0] sm:$0xff] }
  0xbf   :  { %977 = vmatpush.msrb.mxu2 %v402_v56  ;;  %996 = vmatpush.msrb.mxu3 %v419_v57  ;;  %v467_v56 = vld [vmem:[%s2690_s1 + $0xd38] sm:$0xff]  ;;  %v484_v57 = vld [vmem:[%s2690_s1 + $0xdc0] sm:$0xff] }
  0xc0   :  { %938 = vmatpush.msrb.mxu0 %v369_v58  ;;  %957 = vmatpush.msrb.mxu1 %v386_v59  ;;  %v434_v58 = vld [vmem:[%s2690_s1 + $0xc30] sm:$0xff]  ;;  %v451_v59 = vld [vmem:[%s2690_s1 + $0xcb8] sm:$0xff] }
  0xc1   :  { %978 = vmatpush.msrb.mxu2 %v401_v60  ;;  %997 = vmatpush.msrb.mxu3 %v418_v61  ;;  %v466_v60 = vld [vmem:[%s2690_s1 + $0xd30] sm:$0xff]  ;;  %v483_v61 = vld [vmem:[%s2690_s1 + $0xdb8] sm:$0xff] }
  0xc2   :  { %939 = vmatpush.msrb.mxu0 %v368_v62  ;;  %958 = vmatpush.msrb.mxu1 %v385_v63  ;;  %v433_v62 = vld [vmem:[%s2690_s1 + $0xc28] sm:$0xff]  ;;  %v450_v63 = vld [vmem:[%s2690_s1 + $0xcb0] sm:$0xff] }
  0xc3   :  { %979 = vmatpush.msrb.mxu2 %v400_v0  ;;  %998 = vmatpush.msrb.mxu3 %v417_v1  ;;  %v465_v0 = vld [vmem:[%s2690_s1 + $0xd28] sm:$0xff]  ;;  %v482_v1 = vld [vmem:[%s2690_s1 + $0xdb0] sm:$0xff] }
  0xc4   :  { %940 = vmatpush.msrb.mxu0 %v367_v2  ;;  %959 = vmatpush.msrb.mxu1 %v384_v3  ;;  %v432_v2 = vld [vmem:[%s2690_s1 + $0xc20] sm:$0xff]  ;;  %v449_v3 = vld [vmem:[%s2690_s1 + $0xca8] sm:$0xff] }
  0xc5   :  { %980 = vmatpush.msrb.mxu2 %v399_v4  ;;  %999 = vmatpush.msrb.mxu3 %v416_v5  ;;  %v464_v4 = vld [vmem:[%s2690_s1 + $0xd20] sm:$0xff]  ;;  %v481_v5 = vld [vmem:[%s2690_s1 + $0xda8] sm:$0xff] }
  0xc6   :  { %941 = vmatpush.msrb.mxu0 %v366_v6  ;;  %960 = vmatpush.msrb.mxu1 %v383_v7  ;;  %v431_v6 = vld [vmem:[%s2690_s1 + $0xc18] sm:$0xff]  ;;  %v448_v7 = vld [vmem:[%s2690_s1 + $0xca0] sm:$0xff] }
  0xc7   :  { %981 = vmatpush.msrb.mxu2 %v398_v8  ;;  %1000 = vmatpush.msrb.mxu3 %v415_v9  ;;  %v463_v8 = vld [vmem:[%s2690_s1 + $0xd18] sm:$0xff]  ;;  %v480_v9 = vld [vmem:[%s2690_s1 + $0xda0] sm:$0xff] }
  0xc8   :  { %942 = vmatpush.msrb.mxu0 %v365_v10  ;;  %961 = vmatpush.msrb.mxu1 %v382_v11  ;;  %v430_v10 = vld [vmem:[%s2690_s1 + $0xc10] sm:$0xff]  ;;  %v447_v11 = vld [vmem:[%s2690_s1 + $0xc98] sm:$0xff] }
  0xc9   :  { %982 = vmatpush.msrb.mxu2 %v397_v12  ;;  %1001 = vmatpush.msrb.mxu3 %v414_v13  ;;  %v462_v12 = vld [vmem:[%s2690_s1 + $0xd10] sm:$0xff]  ;;  %v479_v13 = vld [vmem:[%s2690_s1 + $0xd98] sm:$0xff] }
  0xca   :  { %943 = vmatpush.msrb.mxu0 %v364_v14  ;;  %962 = vmatpush.msrb.mxu1 %v381_v15  ;;  %v429_v14 = vld [vmem:[%s2690_s1 + $0xc08] sm:$0xff]  ;;  %v446_v15 = vld [vmem:[%s2690_s1 + $0xc90] sm:$0xff] }
  0xcb   :  { %983 = vmatpush.msrb.mxu2 %v396_v16  ;;  %1002 = vmatpush.msrb.mxu3 %v413_v17  ;;  %v461_v16 = vld [vmem:[%s2690_s1 + $0xd08] sm:$0xff]  ;;  %v478_v17 = vld [vmem:[%s2690_s1 + $0xd90] sm:$0xff] }
  0xcc   :  { %944 = vmatmul.f32.vlgmr.msrb.gmra.mxu0 %v34_v18  ;;  %984 = vmatmul.f32.vlgmr.msrb.gmra.mxu2 %v36_v19  ;;  %v428_v18 = vld [vmem:[%s2690_s1 + $0xc00] sm:$0xff]  ;;  %v445_v19 = vld [vmem:[%s2690_s1 + $0xc88] sm:$0xff] }
  0xcd   :  { %1008 = vmatpush.msra.mxu0 %v443_v20  ;;  %1048 = vmatpush.msra.mxu2 %v475_v21  ;;  %v460_v20 = vld [vmem:[%s2690_s1 + $0xd00] sm:$0xff]  ;;  %v477_v21 = vld [vmem:[%s2690_s1 + $0xd88] sm:$0xff] }
  0xce   :  { %963 = vmatpush.msrb.mxu1 %v380_v22  ;;  %1003 = vmatpush.msrb.mxu3 %v412_v23  ;;  %v38_v22 = vld [vmem:[%s2691_s0 + $0xc0] sm:$0xff]  ;;  %v40_v23 = vld [vmem:[%s2691_s0 + $0xd0] sm:$0xff] }
  0xcf   :  { %964 = vmatmul.f32.vlgmr.msrb.gmra.mxu1 %v35_v24  ;;  %1004 = vmatmul.f32.vlgmr.msrb.gmra.mxu3 %v37_v25  ;;  %v507_v24 = vld [vmem:[%s2690_s1 + $0xe78] sm:$0xff]  ;;  %v444_v25 = vld [vmem:[%s2690_s1 + $0xc80] sm:$0xff] }
  0xd0   :  { %1009 = vmatpush.msra.mxu0 %v442_v26  ;;  %1028 = vmatpush.msra.mxu1 %v459_v27  ;;  %v476_v26 = vld [vmem:[%s2690_s1 + $0xd80] sm:$0xff]  ;;  %v39_v27 = vld [vmem:[%s2691_s0 + $0xc8] sm:$0xff] }
  0xd1   :  { %1049 = vmatpush.msra.mxu2 %v474_v28  ;;  %1068 = vmatpush.msra.mxu3 %v491_v29  ;;  %v41_v28 = vld [vmem:[%s2691_s0 + $0xd8] sm:$0xff]  ;;  %v506_v29 = vld [vmem:[%s2690_s1 + $0xe70] sm:$0xff] }
  0xd2   :  { %1010 = vmatpush.msra.mxu0 %v441_v30  ;;  %1029 = vmatpush.msra.mxu1 %v458_v31  ;;  %v523_v30 = vld [vmem:[%s2690_s1 + $0xef8] sm:$0xff]  ;;  %v505_v31 = vld [vmem:[%s2690_s1 + $0xe68] sm:$0xff] }
  0xd3   :  { %1050 = vmatpush.msra.mxu2 %v473_v32  ;;  %1069 = vmatpush.msra.mxu3 %v490_v33  ;;  %v522_v32 = vld [vmem:[%s2690_s1 + $0xef0] sm:$0xff]  ;;  %v504_v33 = vld [vmem:[%s2690_s1 + $0xe60] sm:$0xff] }
  0xd4   :  { %1011 = vmatpush.msra.mxu0 %v440_v34  ;;  %1030 = vmatpush.msra.mxu1 %v457_v35  ;;  %v521_v34 = vld [vmem:[%s2690_s1 + $0xee8] sm:$0xff]  ;;  %v503_v35 = vld [vmem:[%s2690_s1 + $0xe58] sm:$0xff] }
  0xd5   :  { %1051 = vmatpush.msra.mxu2 %v472_v36  ;;  %1070 = vmatpush.msra.mxu3 %v489_v37  ;;  %v520_v36 = vld [vmem:[%s2690_s1 + $0xee0] sm:$0xff]  ;;  %v502_v37 = vld [vmem:[%s2690_s1 + $0xe50] sm:$0xff] }
  0xd6   :  { %1012 = vmatpush.msra.mxu0 %v439_v38  ;;  %1031 = vmatpush.msra.mxu1 %v456_v39  ;;  %v519_v38 = vld [vmem:[%s2690_s1 + $0xed8] sm:$0xff]  ;;  %v501_v39 = vld [vmem:[%s2690_s1 + $0xe48] sm:$0xff] }
  0xd7   :  { %1052 = vmatpush.msra.mxu2 %v471_v40  ;;  %1071 = vmatpush.msra.mxu3 %v488_v41  ;;  %v518_v40 = vld [vmem:[%s2690_s1 + $0xed0] sm:$0xff]  ;;  %v500_v41 = vld [vmem:[%s2690_s1 + $0xe40] sm:$0xff] }
  0xd8   :  { %1013 = vmatpush.msra.mxu0 %v438_v42  ;;  %1032 = vmatpush.msra.mxu1 %v455_v43  ;;  %v517_v42 = vld [vmem:[%s2690_s1 + $0xec8] sm:$0xff]  ;;  %v499_v43 = vld [vmem:[%s2690_s1 + $0xe38] sm:$0xff] }
  0xd9   :  { %1053 = vmatpush.msra.mxu2 %v470_v44  ;;  %1072 = vmatpush.msra.mxu3 %v487_v45  ;;  %v516_v44 = vld [vmem:[%s2690_s1 + $0xec0] sm:$0xff]  ;;  %v498_v45 = vld [vmem:[%s2690_s1 + $0xe30] sm:$0xff] }
  0xda   :  { %1014 = vmatpush.msra.mxu0 %v437_v46  ;;  %1033 = vmatpush.msra.mxu1 %v454_v47  ;;  %v515_v46 = vld [vmem:[%s2690_s1 + $0xeb8] sm:$0xff]  ;;  %v497_v47 = vld [vmem:[%s2690_s1 + $0xe28] sm:$0xff] }
  0xdb   :  { %1054 = vmatpush.msra.mxu2 %v469_v48  ;;  %1073 = vmatpush.msra.mxu3 %v486_v49  ;;  %v514_v48 = vld [vmem:[%s2690_s1 + $0xeb0] sm:$0xff]  ;;  %v496_v49 = vld [vmem:[%s2690_s1 + $0xe20] sm:$0xff] }
  0xdc   :  { %1015 = vmatpush.msra.mxu0 %v436_v50  ;;  %1034 = vmatpush.msra.mxu1 %v453_v51  ;;  %v513_v50 = vld [vmem:[%s2690_s1 + $0xea8] sm:$0xff]  ;;  %v495_v51 = vld [vmem:[%s2690_s1 + $0xe18] sm:$0xff] }
  0xdd   :  { %1055 = vmatpush.msra.mxu2 %v468_v52  ;;  %1074 = vmatpush.msra.mxu3 %v485_v53  ;;  %v512_v52 = vld [vmem:[%s2690_s1 + $0xea0] sm:$0xff]  ;;  %v494_v53 = vld [vmem:[%s2690_s1 + $0xe10] sm:$0xff] }
  0xde   :  { %1016 = vmatpush.msra.mxu0 %v435_v54  ;;  %1035 = vmatpush.msra.mxu1 %v452_v55  ;;  %v511_v54 = vld [vmem:[%s2690_s1 + $0xe98] sm:$0xff]  ;;  %v493_v55 = vld [vmem:[%s2690_s1 + $0xe08] sm:$0xff] }
  0xdf   :  { %1056 = vmatpush.msra.mxu2 %v467_v56  ;;  %1075 = vmatpush.msra.mxu3 %v484_v57  ;;  %v510_v56 = vld [vmem:[%s2690_s1 + $0xe90] sm:$0xff]  ;;  %v492_v57 = vld [vmem:[%s2690_s1 + $0xe00] sm:$0xff] }
  0xe0   :  { %1017 = vmatpush.msra.mxu0 %v434_v58  ;;  %1036 = vmatpush.msra.mxu1 %v451_v59  ;;  %v509_v58 = vld [vmem:[%s2690_s1 + $0xe88] sm:$0xff]  ;;  %v42_v59 = vld [vmem:[%s2691_s0 + $0xe0] sm:$0xff] }
  0xe1   :  { %1057 = vmatpush.msra.mxu2 %v466_v60  ;;  %1076 = vmatpush.msra.mxu3 %v483_v61  ;;  %v508_v60 = vld [vmem:[%s2690_s1 + $0xe80] sm:$0xff]  ;;  %v43_v61 = vld [vmem:[%s2691_s0 + $0xe8] sm:$0xff] }
  0xe2   :  { %1018 = vmatpush.msra.mxu0 %v433_v62  ;;  %1037 = vmatpush.msra.mxu1 %v450_v63  ;;  %v1133_v62 = vld [vmem:[%s2692_s2] ss:$0 sm:$0xff]  ;;  %v545_v63 = vpop.f32.mrf.mxu0 }
  0xe3   :  { %1058 = vmatpush.msra.mxu2 %v465_v0  ;;  %1077 = vmatpush.msra.mxu3 %v482_v1  ;;  %v546_v0 = vadd.f32 %v1133_v62, %v545_v63  ;;  %v565_v1 = vpop.f32.mrf.mxu1 }
  0xe4   :  { %1019 = vmatpush.msra.mxu0 %v432_v2  ;;  %1038 = vmatpush.msra.mxu1 %v449_v3  ;;  %v585_v3 = vpop.f32.mrf.mxu2 }
  0xe5   :  { %1059 = vmatpush.msra.mxu2 %v464_v4  ;;  %1078 = vmatpush.msra.mxu3 %v481_v5  ;;  %v566_v2 = vadd.f32 %v565_v1, %v546_v0  ;;  %v605_v5 = vpop.f32.mrf.mxu3 }
  0xe6   :  { %1020 = vmatpush.msra.mxu0 %v431_v6  ;;  %1039 = vmatpush.msra.mxu1 %v448_v7 }
  0xe7   :  { %1060 = vmatpush.msra.mxu2 %v463_v8  ;;  %1079 = vmatpush.msra.mxu3 %v480_v9  ;;  %v586_v4 = vadd.f32 %v585_v3, %v566_v2 }
  0xe8   :  { %1021 = vmatpush.msra.mxu0 %v430_v10  ;;  %1040 = vmatpush.msra.mxu1 %v447_v11 }
  0xe9   :  { %1061 = vmatpush.msra.mxu2 %v462_v12  ;;  %1080 = vmatpush.msra.mxu3 %v479_v13  ;;  %v606_v6 = vadd.f32 %v605_v5, %v586_v4 }
  0xea   :  { %1022 = vmatpush.msra.mxu0 %v429_v14  ;;  %1041 = vmatpush.msra.mxu1 %v446_v15  ;;  %v625_v7 = vpop.f32.mrf.mxu0 }
  0xeb   :  { %1062 = vmatpush.msra.mxu2 %v461_v16  ;;  %1081 = vmatpush.msra.mxu3 %v478_v17  ;;  %v626_v8 = vadd.f32 %v625_v7, %v606_v6  ;;  %v645_v9 = vpop.f32.mrf.mxu1 }
  0xec   :  { %1023 = vmatpush.msra.mxu0 %v428_v18  ;;  %1042 = vmatpush.msra.mxu1 %v445_v19  ;;  %v665_v11 = vpop.f32.mrf.mxu2 }
  0xed   :  { %1063 = vmatpush.msra.mxu2 %v460_v20  ;;  %1082 = vmatpush.msra.mxu3 %v477_v21  ;;  %v646_v10 = vadd.f32 %v645_v9, %v626_v8  ;;  %v685_v13 = vpop.f32.mrf.mxu3 }
  0xee   :  { %1024 = vmatmul.f32.vlgmr.msra.gmra.mxu0 %v38_v22  ;;  %1064 = vmatmul.f32.vlgmr.msra.gmra.mxu2 %v40_v23 }
  0xef   :  { %1088 = vmatpush.msrb.mxu0 %v507_v24  ;;  %1043 = vmatpush.msra.mxu1 %v444_v25  ;;  %v666_v12 = vadd.f32 %v665_v11, %v646_v10 }
  0xf0   :  { %1083 = vmatpush.msra.mxu3 %v476_v26  ;;  %1044 = vmatmul.f32.vlgmr.msra.gmra.mxu1 %v39_v27 }
  0xf1   :  { %1084 = vmatmul.f32.vlgmr.msra.gmra.mxu3 %v41_v28  ;;  %1089 = vmatpush.msrb.mxu0 %v506_v29  ;;  %v686_v15 = vadd.f32 %v685_v13, %v666_v12 }
  0xf2   :  { %1108 = vmatpush.msrb.mxu1 %v523_v30  ;;  %v705_v14 = vpop.f32.mrf.mxu0 }
  0xf3   :  { %1090 = vmatpush.msrb.mxu0 %v505_v31  ;;  %v706_v16 = vadd.f32 %v705_v14, %v686_v15  ;;  %v725_v17 = vpop.f32.mrf.mxu1 }
  0xf4   :  { %1109 = vmatpush.msrb.mxu1 %v522_v32  ;;  %v745_v18 = vpop.f32.mrf.mxu2 }
  0xf5   :  { %1091 = vmatpush.msrb.mxu0 %v504_v33  ;;  %v726_v19 = vadd.f32 %v725_v17, %v706_v16  ;;  %v765_v21 = vpop.f32.mrf.mxu3 }
  0xf6   :  { %1110 = vmatpush.msrb.mxu1 %v521_v34 }
  0xf7   :  { %1092 = vmatpush.msrb.mxu0 %v503_v35  ;;  %v746_v20 = vadd.f32 %v745_v18, %v726_v19 }
  0xf8   :  { %1111 = vmatpush.msrb.mxu1 %v520_v36 }
  0xf9   :  { %1093 = vmatpush.msrb.mxu0 %v502_v37  ;;  %v766_v23 = vadd.f32 %v765_v21, %v746_v20 }
  0xfa   :  { %1112 = vmatpush.msrb.mxu1 %v519_v38 }
  0xfb   :  { %1094 = vmatpush.msrb.mxu0 %v501_v39 }
  0xfc   :  { %1113 = vmatpush.msrb.mxu1 %v518_v40 }
  0xfd   :  { %1095 = vmatpush.msrb.mxu0 %v500_v41 }
  0xfe   :  { %1114 = vmatpush.msrb.mxu1 %v517_v42 }
  0xff   :  { %1096 = vmatpush.msrb.mxu0 %v499_v43 }
 0x100   :  { %1115 = vmatpush.msrb.mxu1 %v516_v44 }
 0x101   :  { %1097 = vmatpush.msrb.mxu0 %v498_v45 }
 0x102   :  { %1116 = vmatpush.msrb.mxu1 %v515_v46 }
 0x103   :  { %1098 = vmatpush.msrb.mxu0 %v497_v47 }
 0x104   :  { %1117 = vmatpush.msrb.mxu1 %v514_v48 }
 0x105   :  { %1099 = vmatpush.msrb.mxu0 %v496_v49  ;;  %v785_v22 = vpop.f32.mrf.mxu0 }
 0x106   :  { %1118 = vmatpush.msrb.mxu1 %v513_v50  ;;  %v786_v24 = vadd.f32 %v785_v22, %v766_v23 }
 0x107   :  { %1100 = vmatpush.msrb.mxu0 %v495_v51 }
 0x108   :  { %1119 = vmatpush.msrb.mxu1 %v512_v52  ;;  %v805_v25 = vpop.f32.mrf.mxu1 }
 0x109   :  { %1101 = vmatpush.msrb.mxu0 %v494_v53  ;;  %v806_v27 = vadd.f32 %v805_v25, %v786_v24 }
 0x10a   :  { %1120 = vmatpush.msrb.mxu1 %v511_v54 }
 0x10b   :  { %1102 = vmatpush.msrb.mxu0 %v493_v55  ;;  %v825_v26 = vpop.f32.mrf.mxu2 }
 0x10c   :  { %1121 = vmatpush.msrb.mxu1 %v510_v56  ;;  %v826_v28 = vadd.f32 %v825_v26, %v806_v27 }
 0x10d   :  { %1103 = vmatpush.msrb.mxu0 %v492_v57 }
 0x10e   :  { %1122 = vmatpush.msrb.mxu1 %v509_v58  ;;  %1104 = vmatmul.f32.vlgmr.msrb.gmra.mxu0 %v42_v59  ;;  %v845_v29 = vpop.f32.mrf.mxu3 }
 0x10f   :  { %v846_v31 = vadd.f32 %v845_v29, %v826_v28 }
 0x110   :  { %1123 = vmatpush.msrb.mxu1 %v508_v60 }
 0x111   :  { %1124 = vmatmul.f32.vlgmr.msrb.gmra.mxu1 %v43_v61 }
 0x127   :  { %v865_v30 = vpop.f32.mrf.mxu0 }
 0x128   :  { %v866_v32 = vadd.f32 %v865_v30, %v846_v31 }
 0x12a   :  { %v885_v33 = vpop.f32.mrf.mxu1 }
 0x12b   :  { %v886_v35 = vadd.f32 %v885_v33, %v866_v32 }
 0x12d   :  { %v905_v34 = vpop.f32.mrf.mxu2 }
 0x12e   :  { %v906_v36 = vadd.f32 %v905_v34, %v886_v35 }
 0x130   :  { %v925_v37 = vpop.f32.mrf.mxu3 }
 0x131   :  { %v926_v39 = vadd.f32 %v925_v37, %v906_v36 }
 0x149   :  { %v945_v38 = vpop.f32.mrf.mxu0 }
 0x14a   :  { %v946_v40 = vadd.f32 %v945_v38, %v926_v39 }
 0x14c   :  { %v965_v41 = vpop.f32.mrf.mxu1 }
 0x14d   :  { %v966_v43 = vadd.f32 %v965_v41, %v946_v40 }
 0x14f   :  { %v985_v42 = vpop.f32.mrf.mxu2 }
 0x150   :  { %v986_v44 = vadd.f32 %v985_v42, %v966_v43 }
 0x152   :  { %v1005_v45 = vpop.f32.mrf.mxu3 }
 0x153   :  { %v1006_v47 = vadd.f32 %v1005_v45, %v986_v44 }
 0x16b   :  { %v1025_v46 = vpop.f32.mrf.mxu0 }
 0x16c   :  { %v1026_v48 = vadd.f32 %v1025_v46, %v1006_v47 }
 0x16d   :  { %v1045_v49 = vpop.f32.mrf.mxu1 }
 0x16e   :  { %v1046_v51 = vadd.f32 %v1045_v49, %v1026_v48 }
 0x171   :  { %v1065_v50 = vpop.f32.mrf.mxu2 }
 0x172   :  { %v1066_v52 = vadd.f32 %v1065_v50, %v1046_v51 }
 0x174   :  { %v1085_v53 = vpop.f32.mrf.mxu3 }
 0x175   :  { %v1086_v54 = vadd.f32 %v1085_v53, %v1066_v52 }
 0x18b   :  { %v1105_v55 = vpop.f32.mrf.mxu0 }
 0x18c   :  { %v1106_v56 = vadd.f32 %v1105_v55, %v1086_v54 }
 0x18e   :  { %v1125_v57 = vpop.f32.mrf.mxu1 }
 0x18f   :  { %v1126_v58 = vadd.f32 %v1125_v57, %v1106_v56 }
 0x191   :  { %1128 = vst [vmem:[%s2693_s3] sm:$0xff] %v1126_v58 }

</bundles_post_ra>
